<compile_context>
chip_gen: v7x
topology: tpu7x:2x2x1
jax: 0.10.0
libtpu: 0.0.40
codegen_flags: <defaults>
</compile_context>

<pallas_src>
import functools

import numpy as np
import jax
import jax.numpy as jnp
from jax.experimental import pallas as pl
from jax.experimental.pallas import tpu as pltpu


_TAPS3 = tuple((dy, dx) for dy in (-1, 0, 1) for dx in (-1, 0, 1))


# ----------------------------------------------------------------------------
# Fused whole-bottleneck kernel (single VMEM tile)
# ----------------------------------------------------------------------------
def _bottleneck_kernel(xh_ref, xl_ref, w1h_ref, w1l_ref, b1_ref,
                       w2_ref, b2_ref, w3_ref, b3_ref, mask_ref,
                       out_ref, pad_ref, *, M, Wl, ch_blk):
    f32 = jnp.float32
    xh = xh_ref[...]                       # (M, 4*cin_h)  high input, 2x2-block layout
    xl = xl_ref[...]                       # (M, cin_l)    low input
    pad = Wl + 1                           # covers the largest 3x3 row shift

    # ---- conv1 (1x1 octconv) + BN + ReLU ------------------------------------
    # Pool (h->l) and nearest upsample (l->h) are folded into the weights, so
    # two accumulating matmuls produce the combined [high-block | low]
    # intermediate; no XLA-side activation concat, pool or upsample.
    h1 = jnp.dot(xh, w1h_ref[...], preferred_element_type=f32)
    h1 = h1 + jnp.dot(xl, w1l_ref[...], preferred_element_type=f32)
    h1 = jnp.maximum(h1 + b1_ref[...], 0.0)              # (M, c1)
    c1 = h1.shape[1]

    # ---- conv2 (3x3 octconv) = 9 shifted accumulating matmuls ---------------
    # h1 lives on the low-res row grid (high channels carried as 2x2 pixel
    # blocks in the lanes), so one shifted read per tap serves all four octave
    # branches; the padded VMEM scratch supplies the shifted rows and the
    # (constant) tap masks zero rows whose source pixel is outside the image.
    pad_ref[...] = jnp.zeros((M + 2 * pad, c1), f32)
    pad_ref[pl.ds(pad, M), :] = h1
    acc = jnp.zeros((M, c1), f32)
    for t, (dy, dx) in enumerate(_TAPS3):
        off = dy * Wl + dx
        shifted = pad_ref[pl.ds(pad + off, M), :] * mask_ref[t]
        acc = acc + jnp.dot(shifted, w2_ref[t], preferred_element_type=f32)
    h2 = jnp.maximum(acc + b2_ref[...], 0.0)              # (M, c1)

    # ---- conv3 (1x1 octconv) + BN + residual + final ReLU --------------------
    # One lane-dense output slab [high-block | low].
    y = jnp.dot(h2, w3_ref[...], preferred_element_type=f32) + b3_ref[...]
    out_ref[:, :ch_blk] = jnp.maximum(y[:, :ch_blk] + xh, 0.0)
    out_ref[:, ch_blk:] = jnp.maximum(y[:, ch_blk:] + xl, 0.0)


# ----------------------------------------------------------------------------
# Trace-time layout plumbing (inputs / outputs only; constant-foldable masks)
# ----------------------------------------------------------------------------
def to_block(x):
    """NHWC high-res -> (N*Hl*Wl, 4*C): one row per 2x2 pixel block (lane-dense)."""
    N, H, W, C = x.shape
    Hl, Wl = H // 2, W // 2
    x = x.reshape(N, Hl, 2, Wl, 2, C).transpose(0, 1, 3, 2, 4, 5)
    return x.reshape(N * Hl * Wl, 4 * C)


def from_block(xb, N, Hl, Wl):
    """Inverse of to_block."""
    C = xb.shape[-1] // 4
    x = xb.reshape(N, Hl, Wl, 2, 2, C).transpose(0, 1, 3, 2, 4, 5)
    return x.reshape(N, 2 * Hl, 2 * Wl, C)


def _tap_masks(N, Hl, Wl):
    """Shape-only validity masks for the 9 conv2 taps; constant-folded by XLA."""
    y = jnp.arange(Hl * Wl, dtype=jnp.int32) // Wl
    x = jnp.arange(Hl * Wl, dtype=jnp.int32) % Wl
    masks = []
    for dy, dx in _TAPS3:
        v = (y + dy >= 0) & (y + dy < Hl) & (x + dx >= 0) & (x + dx < Wl)
        masks.append(jnp.tile(v, N))
    return jnp.stack(masks).astype(jnp.float32)[..., None]   # (9, N*Hl*Wl, 1)


# ----------------------------------------------------------------------------
# Forward pass
# ----------------------------------------------------------------------------
def octconv_bottleneck(x_h, x_l, params):
    N, H, W, cin_h = x_h.shape
    _, Hl, Wl, cin_l = x_l.shape
    M = N * Hl * Wl
    ch_blk = 4 * cin_h                   # identity residual => fin_h == cin_h

    xh_blk = to_block(x_h)               # (M, 4*cin_h) lane-dense input slab
    xl_flat = x_l.reshape(M, cin_l)      # (M, cin_l)
    masks = _tap_masks(N, Hl, Wl)        # (9, M, 1) constant

    c1 = params["b1"].shape[1]
    cout = params["b3"].shape[1]         # = ch_blk + cin_l
    pad = Wl + 1

    operands = (xh_blk, xl_flat, params["w1_h"], params["w1_l"], params["b1"],
                params["w2"], params["b2"], params["w3"], params["b3"], masks)
    flops = 2 * M * (4 * cin_h * c1 + cin_l * c1 + len(_TAPS3) * c1 * c1 + c1 * cout)
    bytes_accessed = (sum(int(a.size) for a in operands) + M * cout) * 4

    kernel = functools.partial(_bottleneck_kernel, M=M, Wl=Wl, ch_blk=ch_blk)
    out = pl.pallas_call(
        kernel,
        out_shape=jax.ShapeDtypeStruct((M, cout), jnp.float32),
        scratch_shapes=[pltpu.VMEM((M + 2 * pad, c1), jnp.float32)],
        cost_estimate=pl.CostEstimate(flops=flops, transcendentals=0,
                                      bytes_accessed=bytes_accessed),
    )(*operands)

    out_h = from_block(out[:, :ch_blk], N, Hl, Wl)
    out_l = out[:, ch_blk:].reshape(N, Hl, Wl, cin_l)
    return out_h, out_l


# ----------------------------------------------------------------------------
# Parameter preparation: fold eval-mode BN + octave pool/upsample + 2x2 block
# routing into dense per-tap weights operating on the low-res row grid.
# ----------------------------------------------------------------------------
def _init_layer_raw(key, cih, cil, coh, col, k):
    ks = jax.random.split(key, 8)

    def w(kk, ci, co):
        return jax.random.normal(kk, (k, k, ci, co), jnp.float32) / np.sqrt(k * k * ci)

    return dict(
        w_hh=w(ks[0], cih, coh), w_lh=w(ks[1], cil, coh),
        w_hl=w(ks[2], cih, col), w_ll=w(ks[3], cil, col),
        gamma_h=1.0 + 0.05 * jax.random.normal(ks[4], (coh,), jnp.float32),
        beta_h=0.05 * jax.random.normal(ks[5], (coh,), jnp.float32),
        gamma_l=1.0 + 0.05 * jax.random.normal(ks[6], (col,), jnp.float32),
        beta_l=0.05 * jax.random.normal(ks[7], (col,), jnp.float32),
    )


def _fold_block_layer(raw, eps=1e-5):
    """Returns W (T, 4*cin_h + cin_l, 4*cout_h + cout_l) and bias (1, 4*cout_h+cout_l),
    T = 1 (1x1 conv) or 9 (3x3 conv).  Rows/cols are [2x2-block high | low]."""
    w_hh = np.asarray(raw["w_hh"]); w_lh = np.asarray(raw["w_lh"])
    w_hl = np.asarray(raw["w_hl"]); w_ll = np.asarray(raw["w_ll"])
    k = w_hh.shape[0]; r = k // 2
    cih, coh = w_hh.shape[2], w_hh.shape[3]
    cil, col = w_ll.shape[2], w_ll.shape[3]

    inv_std = 1.0 / np.sqrt(1.0 + eps)            # eval-mode BN: mean=0, var=1
    sh = np.asarray(raw["gamma_h"]) * inv_std     # fold BN scale per out-channel
    sl = np.asarray(raw["gamma_l"]) * inv_std
    w_hh = w_hh * sh; w_lh = w_lh * sh
    w_hl = w_hl * sl; w_ll = w_ll * sl

    taps = [(dy, dx) for dy in range(-r, r + 1) for dx in range(-r, r + 1)]
    W = np.zeros((len(taps), 4 * cih + cil, 4 * coh + col), np.float32)
    for t, (dy, dx) in enumerate(taps):
        for ai in (0, 1):
            for bi in (0, 1):
                pi = 2 * ai + bi
                # high(block) -> high(block): route intra-block pixels through the stencil
                for ao in (0, 1):
                    for bo in (0, 1):
                        u, v = 2 * dy + ai - ao, 2 * dx + bi - bo
                        if -r <= u <= r and -r <= v <= r:
                            po = 2 * ao + bo
                            W[t, pi * cih:(pi + 1) * cih,
                                 po * coh:(po + 1) * coh] = w_hh[u + r, v + r]
                # high(block) -> low: 2x2 average pool folded in (0.25 per block pixel)
                W[t, pi * cih:(pi + 1) * cih, 4 * coh:] = 0.25 * w_hl[dy + r, dx + r]
        # low -> high(block): nearest-neighbour upsample folded (replicate to 4 positions)
        for ao in (0, 1):
            for bo in (0, 1):
                po = 2 * ao + bo
                W[t, 4 * cih:, po * coh:(po + 1) * coh] = w_lh[dy + r, dx + r]
        # low -> low
        W[t, 4 * cih:, 4 * coh:] = w_ll[dy + r, dx + r]

    bias = np.concatenate([np.tile(np.asarray(raw["beta_h"]), 4),
                           np.asarray(raw["beta_l"])]).reshape(1, -1).astype(np.float32)
    return jnp.asarray(W), jnp.asarray(bias)


def init_params(key, in_channels=8, out_channels=8, expansion=4, alpha=0.5):
    cin = in_channels * expansion                       # first_block=False
    cfin = out_channels * expansion
    cin_l = int(alpha * cin); cin_h = cin - cin_l
    mid_l = int(alpha * out_channels); mid_h = out_channels - mid_l
    fin_l = int(alpha * cfin); fin_h = cfin - fin_l
    k1, k2, k3 = jax.random.split(key, 3)
    W1, b1 = _fold_block_layer(_init_layer_raw(k1, cin_h, cin_l, mid_h, mid_l, 1))
    W2, b2 = _fold_block_layer(_init_layer_raw(k2, mid_h, mid_l, mid_h, mid_l, 3))
    W3, b3 = _fold_block_layer(_init_layer_raw(k3, mid_h, mid_l, fin_h, fin_l, 1))
    return {
        # conv1 kept split by input operand (no activation K-concat in XLA).
        "w1_h": W1[0, :4 * cin_h, :], "w1_l": W1[0, 4 * cin_h:, :], "b1": b1,
        "w2": W2, "b2": b2,            # (9, c1, c1) per-tap weights for the 3x3 layer
        "w3": W3[0], "b3": b3,
    }


# ----------------------------------------------------------------------------
if __name__ == "__main__":
    key = jax.random.PRNGKey(0)
    kx, kp = jax.random.split(key)

    N, H, W = 2, 16, 16
    in_channels, expansion = 8, 4
    cin = in_channels * expansion        # 32 total input channels (first_block=False)
    cin_l = cin // 2                     # 16 low-frequency channels
    cin_h = cin - cin_l                  # 16 high-frequency channels

    kh, kl = jax.random.split(kx)
    # NHWC inputs (PyTorch NCHW equivalents: x_h [2,16,16,16], x_l [2,16,8,8])
    x_h = jax.random.normal(kh, (N, H, W, cin_h), jnp.float32)
    x_l = jax.random.normal(kl, (N, H // 2, W // 2, cin_l), jnp.float32)

    params = init_params(kp, in_channels=in_channels,
                         out_channels=in_channels, expansion=expansion)

    out_h, out_l = jax.jit(octconv_bottleneck)(x_h, x_l, params)
    jax.block_until_ready((out_h, out_l))

    assert out_h.shape == (N, H, W, cin_h)
    assert out_l.shape == (N, H // 2, W // 2, cin_l)
    assert bool(jnp.all(out_h >= 0)) and bool(jnp.all(out_l >= 0))
    assert bool(jnp.all(jnp.isfinite(out_h))) and bool(jnp.all(jnp.isfinite(out_l)))
    print("KERNEL_OK")
</pallas_src>

<mosaic_0001>
module attributes {stable_mosaic.version = 11 : i64} {
  func.func @_bottleneck_kernel(%arg0: memref<128x64xf32, #tpu.memory_space<vmem>>, %arg1: memref<128x16xf32, #tpu.memory_space<vmem>>, %arg2: memref<64x20xf32, #tpu.memory_space<vmem>>, %arg3: memref<16x20xf32, #tpu.memory_space<vmem>>, %arg4: memref<1x20xf32, #tpu.memory_space<vmem>>, %arg5: memref<9x20x20xf32, #tpu.memory_space<vmem>>, %arg6: memref<1x20xf32, #tpu.memory_space<vmem>>, %arg7: memref<20x80xf32, #tpu.memory_space<vmem>>, %arg8: memref<1x80xf32, #tpu.memory_space<vmem>>, %arg9: memref<9x128x1xf32, #tpu.memory_space<vmem>>, %arg10: memref<128x80xf32, #tpu.memory_space<vmem>>, %arg11: memref<146x20xf32, #tpu.memory_space<vmem>>) attributes {dimension_semantics = [], scalar_prefetch = 0 : i64, scratch_operands = 1 : i64, tpu.core_type = #tpu.core_type<tc>} {
    %c0 = arith.constant 0 : index
    %c0_0 = arith.constant 0 : index
    %0 = vector.load %arg0[%c0, %c0_0] : memref<128x64xf32, #tpu.memory_space<vmem>>, vector<128x64xf32>
    %c0_1 = arith.constant 0 : index
    %c0_2 = arith.constant 0 : index
    %1 = vector.load %arg1[%c0_1, %c0_2] : memref<128x16xf32, #tpu.memory_space<vmem>>, vector<128x16xf32>
    %c0_3 = arith.constant 0 : index
    %c0_4 = arith.constant 0 : index
    %2 = vector.load %arg2[%c0_3, %c0_4] : memref<64x20xf32, #tpu.memory_space<vmem>>, vector<64x20xf32>
    %cst = arith.constant dense<0.000000e+00> : vector<128x20xf32>
    %3 = tpu.matmul %0, %2, %cst {dimension_numbers = #tpu.dot_dimension_numbers<[1], [0], [0], [1], [0, 0, 1, 1], [], []>} : vector<128x64xf32>, vector<64x20xf32>, vector<128x20xf32> -> vector<128x20xf32>
    %c0_5 = arith.constant 0 : index
    %c0_6 = arith.constant 0 : index
    %4 = vector.load %arg3[%c0_5, %c0_6] : memref<16x20xf32, #tpu.memory_space<vmem>>, vector<16x20xf32>
    %cst_7 = arith.constant dense<0.000000e+00> : vector<128x20xf32>
    %5 = tpu.matmul %1, %4, %cst_7 {dimension_numbers = #tpu.dot_dimension_numbers<[1], [0], [0], [1], [0, 0, 1, 1], [], []>} : vector<128x16xf32>, vector<16x20xf32>, vector<128x20xf32> -> vector<128x20xf32>
    %6 = arith.addf %3, %5 : vector<128x20xf32>
    %c0_8 = arith.constant 0 : index
    %c0_9 = arith.constant 0 : index
    %7 = vector.load %arg4[%c0_8, %c0_9] : memref<1x20xf32, #tpu.memory_space<vmem>>, vector<1x20xf32>
    %8 = vector.broadcast %7 : vector<1x20xf32> to vector<128x20xf32>
    %9 = arith.addf %6, %8 : vector<128x20xf32>
    %cst_10 = arith.constant 0.000000e+00 : f32
    %10 = vector.broadcast %cst_10 : f32 to vector<128x20xf32>
    %11 = arith.maximumf %9, %10 : vector<128x20xf32>
    %cst_11 = arith.constant 0.000000e+00 : f32
    %12 = vector.broadcast %cst_11 : f32 to vector<146x20xf32>
    %c0_12 = arith.constant 0 : index
    %c0_13 = arith.constant 0 : index
    %13 = vector.load %arg11[%c0_12, %c0_13] : memref<146x20xf32, #tpu.memory_space<vmem>>, vector<146x20xf32>
    tpu.vector_store %arg11[%c0_12, %c0_13], %12 {strides = array<i32>} : memref<146x20xf32, #tpu.memory_space<vmem>>, vector<146x20xf32>,
    %c9 = arith.constant 9 : index
    %c0_14 = arith.constant 0 : index
    %14 = vector.load %arg11[%c9, %c0_14] : memref<146x20xf32, #tpu.memory_space<vmem>>, vector<128x20xf32>
    tpu.vector_store %arg11[%c9, %c0_14], %11 {strides = array<i32>} : memref<146x20xf32, #tpu.memory_space<vmem>>, vector<128x20xf32>,
    %cst_15 = arith.constant 0.000000e+00 : f32
    %15 = vector.broadcast %cst_15 : f32 to vector<128x20xf32>
    %c0_16 = arith.constant 0 : index
    %c0_17 = arith.constant 0 : index
    %16 = vector.load %arg11[%c0_16, %c0_17] : memref<146x20xf32, #tpu.memory_space<vmem>>, vector<128x20xf32>
    %c0_18 = arith.constant 0 : index
    %c0_19 = arith.constant 0 : index
    %c0_20 = arith.constant 0 : index
    %17 = vector.load %arg9[%c0_18, %c0_19, %c0_20] : memref<9x128x1xf32, #tpu.memory_space<vmem>>, vector<1x128x1xf32>
    %18 = vector.shape_cast %17 : vector<1x128x1xf32> to vector<128x1xf32>
    %19 = vector.broadcast %18 : vector<128x1xf32> to vector<128x20xf32>
    %20 = arith.mulf %16, %19 : vector<128x20xf32>
    %c0_21 = arith.constant 0 : index
    %c0_22 = arith.constant 0 : index
    %c0_23 = arith.constant 0 : index
    %21 = vector.load %arg5[%c0_21, %c0_22, %c0_23] : memref<9x20x20xf32, #tpu.memory_space<vmem>>, vector<1x20x20xf32>
    %22 = vector.shape_cast %21 : vector<1x20x20xf32> to vector<20x20xf32>
    %cst_24 = arith.constant dense<0.000000e+00> : vector<128x20xf32>
    %23 = tpu.matmul %20, %22, %cst_24 {dimension_numbers = #tpu.dot_dimension_numbers<[1], [0], [0], [1], [0, 0, 1, 1], [], []>} : vector<128x20xf32>, vector<20x20xf32>, vector<128x20xf32> -> vector<128x20xf32>
    %24 = arith.addf %15, %23 : vector<128x20xf32>
    %c1 = arith.constant 1 : index
    %c0_25 = arith.constant 0 : index
    %25 = vector.load %arg11[%c1, %c0_25] : memref<146x20xf32, #tpu.memory_space<vmem>>, vector<128x20xf32>
    %c1_26 = arith.constant 1 : index
    %c0_27 = arith.constant 0 : index
    %c0_28 = arith.constant 0 : index
    %26 = vector.load %arg9[%c1_26, %c0_27, %c0_28] : memref<9x128x1xf32, #tpu.memory_space<vmem>>, vector<1x128x1xf32>
    %27 = vector.shape_cast %26 : vector<1x128x1xf32> to vector<128x1xf32>
    %28 = vector.broadcast %27 : vector<128x1xf32> to vector<128x20xf32>
    %29 = arith.mulf %25, %28 : vector<128x20xf32>
    %c1_29 = arith.constant 1 : index
    %c0_30 = arith.constant 0 : index
    %c0_31 = arith.constant 0 : index
    %30 = vector.load %arg5[%c1_29, %c0_30, %c0_31] : memref<9x20x20xf32, #tpu.memory_space<vmem>>, vector<1x20x20xf32>
    %31 = vector.shape_cast %30 : vector<1x20x20xf32> to vector<20x20xf32>
    %cst_32 = arith.constant dense<0.000000e+00> : vector<128x20xf32>
    %32 = tpu.matmul %29, %31, %cst_32 {dimension_numbers = #tpu.dot_dimension_numbers<[1], [0], [0], [1], [0, 0, 1, 1], [], []>} : vector<128x20xf32>, vector<20x20xf32>, vector<128x20xf32> -> vector<128x20xf32>
    %33 = arith.addf %24, %32 : vector<128x20xf32>
    %c2 = arith.constant 2 : index
    %c0_33 = arith.constant 0 : index
    %34 = vector.load %arg11[%c2, %c0_33] : memref<146x20xf32, #tpu.memory_space<vmem>>, vector<128x20xf32>
    %c2_34 = arith.constant 2 : index
    %c0_35 = arith.constant 0 : index
    %c0_36 = arith.constant 0 : index
    %35 = vector.load %arg9[%c2_34, %c0_35, %c0_36] : memref<9x128x1xf32, #tpu.memory_space<vmem>>, vector<1x128x1xf32>
    %36 = vector.shape_cast %35 : vector<1x128x1xf32> to vector<128x1xf32>
    %37 = vector.broadcast %36 : vector<128x1xf32> to vector<128x20xf32>
    %38 = arith.mulf %34, %37 : vector<128x20xf32>
    %c2_37 = arith.constant 2 : index
    %c0_38 = arith.constant 0 : index
    %c0_39 = arith.constant 0 : index
    %39 = vector.load %arg5[%c2_37, %c0_38, %c0_39] : memref<9x20x20xf32, #tpu.memory_space<vmem>>, vector<1x20x20xf32>
    %40 = vector.shape_cast %39 : vector<1x20x20xf32> to vector<20x20xf32>
    %cst_40 = arith.constant dense<0.000000e+00> : vector<128x20xf32>
    %41 = tpu.matmul %38, %40, %cst_40 {dimension_numbers = #tpu.dot_dimension_numbers<[1], [0], [0], [1], [0, 0, 1, 1], [], []>} : vector<128x20xf32>, vector<20x20xf32>, vector<128x20xf32> -> vector<128x20xf32>
    %42 = arith.addf %33, %41 : vector<128x20xf32>
    %c8 = arith.constant 8 : index
    %c0_41 = arith.constant 0 : index
    %43 = vector.load %arg11[%c8, %c0_41] : memref<146x20xf32, #tpu.memory_space<vmem>>, vector<128x20xf32>
    %c3 = arith.constant 3 : index
    %c0_42 = arith.constant 0 : index
    %c0_43 = arith.constant 0 : index
    %44 = vector.load %arg9[%c3, %c0_42, %c0_43] : memref<9x128x1xf32, #tpu.memory_space<vmem>>, vector<1x128x1xf32>
    %45 = vector.shape_cast %44 : vector<1x128x1xf32> to vector<128x1xf32>
    %46 = vector.broadcast %45 : vector<128x1xf32> to vector<128x20xf32>
    %47 = arith.mulf %43, %46 : vector<128x20xf32>
    %c3_44 = arith.constant 3 : index
    %c0_45 = arith.constant 0 : index
    %c0_46 = arith.constant 0 : index
    %48 = vector.load %arg5[%c3_44, %c0_45, %c0_46] : memref<9x20x20xf32, #tpu.memory_space<vmem>>, vector<1x20x20xf32>
    %49 = vector.shape_cast %48 : vector<1x20x20xf32> to vector<20x20xf32>
    %cst_47 = arith.constant dense<0.000000e+00> : vector<128x20xf32>
    %50 = tpu.matmul %47, %49, %cst_47 {dimension_numbers = #tpu.dot_dimension_numbers<[1], [0], [0], [1], [0, 0, 1, 1], [], []>} : vector<128x20xf32>, vector<20x20xf32>, vector<128x20xf32> -> vector<128x20xf32>
    %51 = arith.addf %42, %50 : vector<128x20xf32>
    %c9_48 = arith.constant 9 : index
    %c0_49 = arith.constant 0 : index
    %52 = vector.load %arg11[%c9_48, %c0_49] : memref<146x20xf32, #tpu.memory_space<vmem>>, vector<128x20xf32>
    %c4 = arith.constant 4 : index
    %c0_50 = arith.constant 0 : index
    %c0_51 = arith.constant 0 : index
    %53 = vector.load %arg9[%c4, %c0_50, %c0_51] : memref<9x128x1xf32, #tpu.memory_space<vmem>>, vector<1x128x1xf32>
    %54 = vector.shape_cast %53 : vector<1x128x1xf32> to vector<128x1xf32>
    %55 = vector.broadcast %54 : vector<128x1xf32> to vector<128x20xf32>
    %56 = arith.mulf %52, %55 : vector<128x20xf32>
    %c4_52 = arith.constant 4 : index
    %c0_53 = arith.constant 0 : index
    %c0_54 = arith.constant 0 : index
    %57 = vector.load %arg5[%c4_52, %c0_53, %c0_54] : memref<9x20x20xf32, #tpu.memory_space<vmem>>, vector<1x20x20xf32>
    %58 = vector.shape_cast %57 : vector<1x20x20xf32> to vector<20x20xf32>
    %cst_55 = arith.constant dense<0.000000e+00> : vector<128x20xf32>
    %59 = tpu.matmul %56, %58, %cst_55 {dimension_numbers = #tpu.dot_dimension_numbers<[1], [0], [0], [1], [0, 0, 1, 1], [], []>} : vector<128x20xf32>, vector<20x20xf32>, vector<128x20xf32> -> vector<128x20xf32>
    %60 = arith.addf %51, %59 : vector<128x20xf32>
    %c10 = arith.constant 10 : index
    %c0_56 = arith.constant 0 : index
    %61 = vector.load %arg11[%c10, %c0_56] : memref<146x20xf32, #tpu.memory_space<vmem>>, vector<128x20xf32>
    %c5 = arith.constant 5 : index
    %c0_57 = arith.constant 0 : index
    %c0_58 = arith.constant 0 : index
    %62 = vector.load %arg9[%c5, %c0_57, %c0_58] : memref<9x128x1xf32, #tpu.memory_space<vmem>>, vector<1x128x1xf32>
    %63 = vector.shape_cast %62 : vector<1x128x1xf32> to vector<128x1xf32>
    %64 = vector.broadcast %63 : vector<128x1xf32> to vector<128x20xf32>
    %65 = arith.mulf %61, %64 : vector<128x20xf32>
    %c5_59 = arith.constant 5 : index
    %c0_60 = arith.constant 0 : index
    %c0_61 = arith.constant 0 : index
    %66 = vector.load %arg5[%c5_59, %c0_60, %c0_61] : memref<9x20x20xf32, #tpu.memory_space<vmem>>, vector<1x20x20xf32>
    %67 = vector.shape_cast %66 : vector<1x20x20xf32> to vector<20x20xf32>
    %cst_62 = arith.constant dense<0.000000e+00> : vector<128x20xf32>
    %68 = tpu.matmul %65, %67, %cst_62 {dimension_numbers = #tpu.dot_dimension_numbers<[1], [0], [0], [1], [0, 0, 1, 1], [], []>} : vector<128x20xf32>, vector<20x20xf32>, vector<128x20xf32> -> vector<128x20xf32>
    %69 = arith.addf %60, %68 : vector<128x20xf32>
    %c16 = arith.constant 16 : index
    %c0_63 = arith.constant 0 : index
    %70 = vector.load %arg11[%c16, %c0_63] : memref<146x20xf32, #tpu.memory_space<vmem>>, vector<128x20xf32>
    %c6 = arith.constant 6 : index
    %c0_64 = arith.constant 0 : index
    %c0_65 = arith.constant 0 : index
    %71 = vector.load %arg9[%c6, %c0_64, %c0_65] : memref<9x128x1xf32, #tpu.memory_space<vmem>>, vector<1x128x1xf32>
    %72 = vector.shape_cast %71 : vector<1x128x1xf32> to vector<128x1xf32>
    %73 = vector.broadcast %72 : vector<128x1xf32> to vector<128x20xf32>
    %74 = arith.mulf %70, %73 : vector<128x20xf32>
    %c6_66 = arith.constant 6 : index
    %c0_67 = arith.constant 0 : index
    %c0_68 = arith.constant 0 : index
    %75 = vector.load %arg5[%c6_66, %c0_67, %c0_68] : memref<9x20x20xf32, #tpu.memory_space<vmem>>, vector<1x20x20xf32>
    %76 = vector.shape_cast %75 : vector<1x20x20xf32> to vector<20x20xf32>
    %cst_69 = arith.constant dense<0.000000e+00> : vector<128x20xf32>
    %77 = tpu.matmul %74, %76, %cst_69 {dimension_numbers = #tpu.dot_dimension_numbers<[1], [0], [0], [1], [0, 0, 1, 1], [], []>} : vector<128x20xf32>, vector<20x20xf32>, vector<128x20xf32> -> vector<128x20xf32>
    %78 = arith.addf %69, %77 : vector<128x20xf32>
    %c17 = arith.constant 17 : index
    %c0_70 = arith.constant 0 : index
    %79 = vector.load %arg11[%c17, %c0_70] : memref<146x20xf32, #tpu.memory_space<vmem>>, vector<128x20xf32>
    %c7 = arith.constant 7 : index
    %c0_71 = arith.constant 0 : index
    %c0_72 = arith.constant 0 : index
    %80 = vector.load %arg9[%c7, %c0_71, %c0_72] : memref<9x128x1xf32, #tpu.memory_space<vmem>>, vector<1x128x1xf32>
    %81 = vector.shape_cast %80 : vector<1x128x1xf32> to vector<128x1xf32>
    %82 = vector.broadcast %81 : vector<128x1xf32> to vector<128x20xf32>
    %83 = arith.mulf %79, %82 : vector<128x20xf32>
    %c7_73 = arith.constant 7 : index
    %c0_74 = arith.constant 0 : index
    %c0_75 = arith.constant 0 : index
    %84 = vector.load %arg5[%c7_73, %c0_74, %c0_75] : memref<9x20x20xf32, #tpu.memory_space<vmem>>, vector<1x20x20xf32>
    %85 = vector.shape_cast %84 : vector<1x20x20xf32> to vector<20x20xf32>
    %cst_76 = arith.constant dense<0.000000e+00> : vector<128x20xf32>
    %86 = tpu.matmul %83, %85, %cst_76 {dimension_numbers = #tpu.dot_dimension_numbers<[1], [0], [0], [1], [0, 0, 1, 1], [], []>} : vector<128x20xf32>, vector<20x20xf32>, vector<128x20xf32> -> vector<128x20xf32>
    %87 = arith.addf %78, %86 : vector<128x20xf32>
    %c18 = arith.constant 18 : index
    %c0_77 = arith.constant 0 : index
    %88 = vector.load %arg11[%c18, %c0_77] : memref<146x20xf32, #tpu.memory_space<vmem>>, vector<128x20xf32>
    %c8_78 = arith.constant 8 : index
    %c0_79 = arith.constant 0 : index
    %c0_80 = arith.constant 0 : index
    %89 = vector.load %arg9[%c8_78, %c0_79, %c0_80] : memref<9x128x1xf32, #tpu.memory_space<vmem>>, vector<1x128x1xf32>
    %90 = vector.shape_cast %89 : vector<1x128x1xf32> to vector<128x1xf32>
    %91 = vector.broadcast %90 : vector<128x1xf32> to vector<128x20xf32>
    %92 = arith.mulf %88, %91 : vector<128x20xf32>
    %c8_81 = arith.constant 8 : index
    %c0_82 = arith.constant 0 : index
    %c0_83 = arith.constant 0 : index
    %93 = vector.load %arg5[%c8_81, %c0_82, %c0_83] : memref<9x20x20xf32, #tpu.memory_space<vmem>>, vector<1x20x20xf32>
    %94 = vector.shape_cast %93 : vector<1x20x20xf32> to vector<20x20xf32>
    %cst_84 = arith.constant dense<0.000000e+00> : vector<128x20xf32>
    %95 = tpu.matmul %92, %94, %cst_84 {dimension_numbers = #tpu.dot_dimension_numbers<[1], [0], [0], [1], [0, 0, 1, 1], [], []>} : vector<128x20xf32>, vector<20x20xf32>, vector<128x20xf32> -> vector<128x20xf32>
    %96 = arith.addf %87, %95 : vector<128x20xf32>
    %c0_85 = arith.constant 0 : index
    %c0_86 = arith.constant 0 : index
    %97 = vector.load %arg6[%c0_85, %c0_86] : memref<1x20xf32, #tpu.memory_space<vmem>>, vector<1x20xf32>
    %98 = vector.broadcast %97 : vector<1x20xf32> to vector<128x20xf32>
    %99 = arith.addf %96, %98 : vector<128x20xf32>
    %cst_87 = arith.constant 0.000000e+00 : f32
    %100 = vector.broadcast %cst_87 : f32 to vector<128x20xf32>
    %101 = arith.maximumf %99, %100 : vector<128x20xf32>
    %c0_88 = arith.constant 0 : index
    %c0_89 = arith.constant 0 : index
    %102 = vector.load %arg7[%c0_88, %c0_89] : memref<20x80xf32, #tpu.memory_space<vmem>>, vector<20x80xf32>
    %cst_90 = arith.constant dense<0.000000e+00> : vector<128x80xf32>
    %103 = tpu.matmul %101, %102, %cst_90 {dimension_numbers = #tpu.dot_dimension_numbers<[1], [0], [0], [1], [0, 0, 1, 1], [], []>} : vector<128x20xf32>, vector<20x80xf32>, vector<128x80xf32> -> vector<128x80xf32>
    %c0_91 = arith.constant 0 : index
    %c0_92 = arith.constant 0 : index
    %104 = vector.load %arg8[%c0_91, %c0_92] : memref<1x80xf32, #tpu.memory_space<vmem>>, vector<1x80xf32>
    %105 = vector.broadcast %104 : vector<1x80xf32> to vector<128x80xf32>
    %106 = arith.addf %103, %105 : vector<128x80xf32>
    %107 = vector.extract_strided_slice %106 {offsets = [0, 0], sizes = [128, 64], strides = [1, 1]} : vector<128x80xf32> to vector<128x64xf32>
    %108 = arith.addf %107, %0 : vector<128x64xf32>
    %cst_93 = arith.constant 0.000000e+00 : f32
    %109 = vector.broadcast %cst_93 : f32 to vector<128x64xf32>
    %110 = arith.maximumf %108, %109 : vector<128x64xf32>
    %c0_94 = arith.constant 0 : index
    %c0_95 = arith.constant 0 : index
    %111 = vector.load %arg10[%c0_94, %c0_95] : memref<128x80xf32, #tpu.memory_space<vmem>>, vector<128x64xf32>
    tpu.vector_store %arg10[%c0_94, %c0_95], %110 {strides = array<i32>} : memref<128x80xf32, #tpu.memory_space<vmem>>, vector<128x64xf32>,
    %112 = vector.extract_strided_slice %106 {offsets = [0, 64], sizes = [128, 16], strides = [1, 1]} : vector<128x80xf32> to vector<128x16xf32>
    %113 = arith.addf %112, %1 : vector<128x16xf32>
    %cst_96 = arith.constant 0.000000e+00 : f32
    %114 = vector.broadcast %cst_96 : f32 to vector<128x16xf32>
    %115 = arith.maximumf %113, %114 : vector<128x16xf32>
    %c0_97 = arith.constant 0 : index
    %c64 = arith.constant 64 : index
    %116 = vector.load %arg10[%c0_97, %c64] : memref<128x80xf32, #tpu.memory_space<vmem>>, vector<128x16xf32>
    tpu.vector_store %arg10[%c0_97, %c64], %115 {strides = array<i32>} : memref<128x80xf32, #tpu.memory_space<vmem>>, vector<128x16xf32>,
    return
  }
}

</mosaic_0001>

<bundles_post_ra>
// kernel: tile.48
= control target key start
LH: loop header
LB: loop body
LE: loop exit
PB: predicated region body
PF: predicated region fallthrough
CT: control target
= control target key end

     0   :  { %v13_v2 = vmov 0   ;;  %s30_s0 = inlined_call_operand.vmem [shape: pred[64], index: 0, kind: input, shape index: {}]   ;;  %s31_s1 = inlined_call_operand.vmem [shape: pred[2,64], index: 1, kind: output, shape index: {}]  }
   0x1   :  { %v4_v0 = vld [vmem:[%s30_s0] ss:$0 sm:$0xff] }
   0x2   :  { %v7_v1 = vand.u32 255, %v4_v0 }
   0x4   :  { %v8_v3 = vpack.c.b16 %v13_v2, %v7_v1 }
   0x6   :  { %v9_v4 = vpack.c.b8 %v13_v2, %v8_v3 }
   0x8   :  { %11 = vst [vmem:[%s31_s1] sm:$0x1] %v9_v4 }

// kernel: octconv_bottleneck.1
= control target key start
LH: loop header
LB: loop body
LE: loop exit
PB: predicated region body
PF: predicated region fallthrough
CT: control target
= control target key end

     0   :  { %v5205_v0 = vmov 0   ;;  %vm77_vm0 = vcmask 130048   ;;  %vm271_vm1 = vcmask 523264   ;;  %vm504_vm2 = vcmask 162816   ;;  %s5207_s25 = smov 64   ;;  %s7066_s9 = inlined_call_operand.vmem [shape: f32[9,128,1], index: 9, kind: input, shape index: {}]   ;;  %s7067_s3 = inlined_call_operand.vmem [shape: f32[16,20], index: 3, kind: input, shape index: {}]   ;;  %s7068_s1 = inlined_call_operand.vmem [shape: f32[128,16], index: 1, kind: input, shape index: {}]   ;;  %s7069_s2 = inlined_call_operand.vmem [shape: f32[64,20], index: 2, kind: input, shape index: {}]   ;;  %s7070_s0 = inlined_call_operand.vmem [shape: f32[128,64], index: 0, kind: input, shape index: {}]   ;;  %s7071_s5 = inlined_call_operand.vmem [shape: f32[9,20,20], index: 5, kind: input, shape index: {}]   ;;  %s7072_s4 = inlined_call_operand.vmem [shape: f32[1,20], index: 4, kind: input, shape index: {}]   ;;  %s7073_s7 = inlined_call_operand.vmem [shape: f32[20,80], index: 7, kind: input, shape index: {}]   ;;  %s7074_s6 = inlined_call_operand.vmem [shape: f32[1,20], index: 6, kind: input, shape index: {}]   ;;  %s7075_s8 = inlined_call_operand.vmem [shape: f32[1,80], index: 8, kind: input, shape index: {}]   ;;  %s7076_s10 = inlined_call_operand.vmem [shape: f32[128,80], index: 10, kind: output, shape index: {}]  }
   0x1   :  { %5172 = vset.pattern.permute.xlu1 %v5205_v0  ;;  %5171 = vset.pattern.permute.xlu0 %v5205_v0  ;;  %v4131_v1 = vld [vmem:[%s7066_s9 + $0x190] sm:$0xff]  ;;  %v4129_v2 = vld [vmem:[%s7066_s9 + $0x180] sm:$0xff]  ;;  %v76_v4 = vld [vmem:[%s7067_s3 + $0x8] sm:$0xff]  ;;  %vm853_vm3 = vcmask 1043456   ;;  %vm523_vm4 = vcmask 156672   ;;  %vm3986_vm5 = vcmask 654848  }
   0x2   :  { %v75_v3 = vld [vmem:[%s7067_s3] sm:$0xff]  ;;  %1588 = vperm.xlu1 %5172, %v4131_v1   ;;  %1578 = vperm.xlu0 %5171, %v4129_v2   ;;  %v4132_v6 = vld [vmem:[%s7066_s9 + $0x198] sm:$0xff]  ;;  %v4130_v9 = vld [vmem:[%s7066_s9 + $0x188] sm:$0xff] }
   0x3   :  { %v4964_v5 = vpack.c.bf16 %v76_v4, %v75_v3  ;;  %v51_v7 = vld [vmem:[%s7068_s1] sm:$0xff]  ;;  %v68_v10 = vld [vmem:[%s7069_s2 + $0x8] sm:$0xff]  ;;  %v69_v14 = vld [vmem:[%s7069_s2 + $0x10] sm:$0xff] }
   0x4   :  { %v67_v8 = vld [vmem:[%s7069_s2] sm:$0xff]  ;;  %4600 = vmatprep.mubr.msk.f32.mxu0 %vm77_vm0, %v51_v7  ;;  %v52_v12 = vld [vmem:[%s7068_s1 + $0x8] sm:$0xff]  ;;  %v70_v15 = vld [vmem:[%s7069_s2 + $0x18] sm:$0xff] }
   0x5   :  { %4965 = vmatprep.subr.bf16.mxu0 %v4964_v5  ;;  %v4968_v11 = vpack.c.bf16 %v68_v10, %v67_v8  ;;  %v4134_v13 = vld [vmem:[%s7066_s9 + $0x1a8] sm:$0xff]  ;;  %v4133_v16 = vld [vmem:[%s7066_s9 + $0x1a0] sm:$0xff]  ;;  %v53_v17 = vld [vmem:[%s7068_s1 + $0x10] sm:$0xff]  ;;  %v4972_v18 = vpack.c.bf16 %v70_v15, %v69_v14 }
   0x6   :  { %4967 = vmatpush3.bf16.msra.mxu0 %v4964_v5  ;;  %1593 = vperm.xlu1 %5172, %v4132_v6   ;;  %v54_v19 = vld [vmem:[%s7068_s1 + $0x18] sm:$0xff]  ;;  %v71_v20 = vld [vmem:[%s7069_s2 + $0x20] sm:$0xff]  ;;  %v72_v21 = vld [vmem:[%s7069_s2 + $0x28] sm:$0xff] }
   0x7   :  { %1583 = vperm.xlu0 %5171, %v4130_v9   ;;  %4969 = vmatprep.subr.bf16.mxu0 %v4968_v11  ;;  %v4136_v22 = vld [vmem:[%s7066_s9 + $0x1b8] sm:$0xff]  ;;  %v55_v23 = vld [vmem:[%s7068_s1 + $0x20] sm:$0xff]  ;;  %v4135_v24 = vld [vmem:[%s7066_s9 + $0x1b0] sm:$0xff]  ;;  %v4976_v25 = vpack.c.bf16 %v72_v21, %v71_v20 }
   0x8   :  { %v73_v26 = vld [vmem:[%s7069_s2 + $0x30] sm:$0xff]  ;;  %v56_v27 = vld [vmem:[%s7068_s1 + $0x28] sm:$0xff]  ;;  %v74_v28 = vld [vmem:[%s7069_s2 + $0x38] sm:$0xff] }
   0x9   :  { %4601 = vmatmul.mubr.msk.f32.vlgmr.msra.gmra.mrb[0].mxu0 %vm77_vm0, %v52_v12  ;;  %v4138_v29 = vld [vmem:[%s7066_s9 + $0x1c8] sm:$0xff]  ;;  %v57_v30 = vld [vmem:[%s7068_s1 + $0x30] sm:$0xff]  ;;  %v4137_v31 = vld [vmem:[%s7066_s9 + $0x1c0] sm:$0xff]  ;;  %v4980_v32 = vpack.c.bf16 %v74_v28, %v73_v26 }
   0xa   :  { %4971 = vmatpush3.bf16.msra.mxu0 %v4968_v11  ;;  %1603 = vperm.xlu1 %5172, %v4134_v13   ;;  %v58_v33 = vld [vmem:[%s7068_s1 + $0x38] sm:$0xff]  ;;  %v59_v35 = vld [vmem:[%s7068_s1 + $0x40] sm:$0xff]  ;;  %v4139_v36 = vld [vmem:[%s7066_s9 + $0x1d0] sm:$0xff] }
   0xb   :  { %1598 = vperm.xlu0 %5171, %v4133_v16   ;;  %4603 = vmatprep.mubr.msk.f32.mxu0 %vm77_vm0, %v53_v17  ;;  %v4140_v34 = vld [vmem:[%s7066_s9 + $0x1d8] sm:$0xff]  ;;  %v60_v37 = vld [vmem:[%s7068_s1 + $0x48] sm:$0xff]  ;;  %v61_v39 = vld [vmem:[%s7068_s1 + $0x50] sm:$0xff] }
   0xc   :  { %4973 = vmatprep.subr.bf16.mxu0 %v4972_v18  ;;  %v4142_v38 = vld [vmem:[%s7066_s9 + $0x1e8] sm:$0xff]  ;;  %v4141_v40 = vld [vmem:[%s7066_s9 + $0x1e0] sm:$0xff]  ;;  %v62_v41 = vld [vmem:[%s7068_s1 + $0x58] sm:$0xff] }
   0xd   :  { %4604 = vmatmul.mubr.msk.f32.gmra.mrb[2].mxu0 %vm77_vm0, %v54_v19  ;;  %v4144_v42 = vld [vmem:[%s7066_s9 + $0x1f8] sm:$0xff]  ;;  %v63_v43 = vld [vmem:[%s7068_s1 + $0x60] sm:$0xff]  ;;  %v4143_v44 = vld [vmem:[%s7066_s9 + $0x1f0] sm:$0xff] }
   0xe   :  { %1613 = vperm.xlu1 %5172, %v4136_v22   ;;  %4606 = vmatprep.mubr.msk.f32.mxu0 %vm77_vm0, %v55_v23  ;;  %v64_v45 = vld [vmem:[%s7068_s1 + $0x68] sm:$0xff]  ;;  %v65_v47 = vld [vmem:[%s7068_s1 + $0x70] sm:$0xff]  ;;  %v4165_v48 = vld [vmem:[%s7066_s9 + $0x200] sm:$0xff] }
   0xf   :  { %1608 = vperm.xlu0 %5171, %v4135_v24   ;;  %4975 = vmatpush3.bf16.msra.mxu0 %v4972_v18  ;;  %v4166_v46 = vld [vmem:[%s7066_s9 + $0x208] sm:$0xff]  ;;  %v66_v49 = vld [vmem:[%s7068_s1 + $0x78] sm:$0xff]  ;;  %v35_v51 = vld [vmem:[%s7070_s0] sm:$0xff] }
  0x10   :  { %4977 = vmatprep.subr.bf16.mxu0 %v4976_v25  ;;  %v4168_v50 = vld [vmem:[%s7066_s9 + $0x218] sm:$0xff]  ;;  %v4167_v52 = vld [vmem:[%s7066_s9 + $0x210] sm:$0xff]  ;;  %v36_v53 = vld [vmem:[%s7070_s0 + $0x8] sm:$0xff] }
  0x11   :  { %4607 = vmatmul.mubr.msk.f32.gmra.mrb[4].mxu0 %vm77_vm0, %v56_v27  ;;  %v4170_v54 = vld [vmem:[%s7066_s9 + $0x228] sm:$0xff]  ;;  %v37_v55 = vld [vmem:[%s7070_s0 + $0x10] sm:$0xff]  ;;  %v4169_v56 = vld [vmem:[%s7066_s9 + $0x220] sm:$0xff] }
  0x12   :  { %1623 = vperm.xlu1 %5172, %v4138_v29   ;;  %4609 = vmatprep.mubr.msk.f32.mxu0 %vm77_vm0, %v57_v30  ;;  %v38_v57 = vld [vmem:[%s7070_s0 + $0x18] sm:$0xff]  ;;  %v39_v59 = vld [vmem:[%s7070_s0 + $0x20] sm:$0xff]  ;;  %v4171_v60 = vld [vmem:[%s7066_s9 + $0x230] sm:$0xff] }
  0x13   :  { %1618 = vperm.xlu0 %5171, %v4137_v31   ;;  %4979 = vmatpush3.bf16.msra.mxu0 %v4976_v25  ;;  %v4172_v58 = vld [vmem:[%s7066_s9 + $0x238] sm:$0xff]  ;;  %v40_v61 = vld [vmem:[%s7070_s0 + $0x28] sm:$0xff]  ;;  %v41_v63 = vld [vmem:[%s7070_s0 + $0x30] sm:$0xff]  ;;  %v5206_v31 = vmov 0.0  }
  0x14   :  { %4981 = vmatprep.subr.bf16.mxu0 %v4980_v32  ;;  %v4174_v62 = vld [vmem:[%s7066_s9 + $0x248] sm:$0xff]  ;;  %v4173_v0 = vld [vmem:[%s7066_s9 + $0x240] sm:$0xff]  ;;  %v42_v1 = vld [vmem:[%s7070_s0 + $0x38] sm:$0xff]  ;;  %505 = vst.msk [vmem:[#allocation2] sm:$0xff] %vm504_vm2, %v5206_v31 }
  0x15   :  { %4610 = vmatmul.mubr.msk.f32.gmra.mrb[6].mxu0 %vm77_vm0, %v58_v33  ;;  %v4176_v2 = vld [vmem:[%s7066_s9 + $0x258] sm:$0xff]  ;;  %v43_v3 = vld [vmem:[%s7070_s0 + $0x40] sm:$0xff]  ;;  %v4175_v4 = vld [vmem:[%s7066_s9 + $0x250] sm:$0xff]  ;;  %506 = vst.msk [vmem:[#allocation2 + $0x8] sm:$0xff] %vm504_vm2, %v5206_v31 }
  0x16   :  { %1633 = vperm.xlu1 %5172, %v4140_v34   ;;  %4612 = vmatprep.mubr.msk.f32.mxu0 %vm77_vm0, %v59_v35  ;;  %v44_v5 = vld [vmem:[%s7070_s0 + $0x48] sm:$0xff]  ;;  %v45_v7 = vld [vmem:[%s7070_s0 + $0x50] sm:$0xff]  ;;  %v4177_v8 = vld [vmem:[%s7066_s9 + $0x260] sm:$0xff]  ;;  %507 = vst.msk [vmem:[#allocation2 + $0x10] sm:$0xff] %vm504_vm2, %v5206_v31 }
  0x17   :  { %1628 = vperm.xlu0 %5171, %v4139_v36   ;;  %4983 = vmatpush3.bf16.msra.mxu0 %v4980_v32  ;;  %v4178_v6 = vld [vmem:[%s7066_s9 + $0x268] sm:$0xff]  ;;  %v46_v9 = vld [vmem:[%s7070_s0 + $0x58] sm:$0xff]  ;;  %v47_v11 = vld [vmem:[%s7070_s0 + $0x60] sm:$0xff]  ;;  %508 = vst.msk [vmem:[#allocation2 + $0x18] sm:$0xff] %vm504_vm2, %v5206_v31 }
  0x18   :  { %v4180_v10 = vld [vmem:[%s7066_s9 + $0x278] sm:$0xff]  ;;  %v4179_v12 = vld [vmem:[%s7066_s9 + $0x270] sm:$0xff]  ;;  %v48_v13 = vld [vmem:[%s7070_s0 + $0x68] sm:$0xff]  ;;  %509 = vst.msk [vmem:[#allocation2 + $0x20] sm:$0xff] %vm504_vm2, %v5206_v31 }
  0x19   :  { %4613 = vmatmul.mubr.msk.f32.gmra.mrb[8].mxu0 %vm77_vm0, %v60_v37  ;;  %v4202_v14 = vld [vmem:[%s7066_s9 + $0x288] sm:$0xff]  ;;  %v49_v15 = vld [vmem:[%s7070_s0 + $0x70] sm:$0xff]  ;;  %v4201_v16 = vld [vmem:[%s7066_s9 + $0x280] sm:$0xff]  ;;  %510 = vst.msk [vmem:[#allocation2 + $0x28] sm:$0xff] %vm504_vm2, %v5206_v31 }
  0x1a   :  { %1643 = vperm.xlu1 %5172, %v4142_v38   ;;  %4615 = vmatprep.mubr.msk.f32.mxu0 %vm77_vm0, %v61_v39  ;;  %v50_v17 = vld [vmem:[%s7070_s0 + $0x78] sm:$0xff]  ;;  %v4203_v19 = vld [vmem:[%s7066_s9 + $0x290] sm:$0xff]  ;;  %v4206_v20 = vld [vmem:[%s7066_s9 + $0x2a8] sm:$0xff]  ;;  %511 = vst.msk [vmem:[#allocation2 + $0x30] sm:$0xff] %vm504_vm2, %v5206_v31 }
  0x1b   :  { %1638 = vperm.xlu0 %5171, %v4141_v40   ;;  %v4204_v18 = vld [vmem:[%s7066_s9 + $0x298] sm:$0xff]  ;;  %v4205_v21 = vld [vmem:[%s7066_s9 + $0x2a0] sm:$0xff]  ;;  %v4207_v23 = vld [vmem:[%s7066_s9 + $0x2b0] sm:$0xff]  ;;  %512 = vst.msk [vmem:[#allocation2 + $0x38] sm:$0xff] %vm504_vm2, %v5206_v31 }
  0x1c   :  { %v4208_v22 = vld [vmem:[%s7066_s9 + $0x2b8] sm:$0xff]  ;;  %v4210_v24 = vld [vmem:[%s7066_s9 + $0x2c8] sm:$0xff]  ;;  %v4209_v25 = vld [vmem:[%s7066_s9 + $0x2c0] sm:$0xff]  ;;  %513 = vst.msk [vmem:[#allocation2 + $0x40] sm:$0xff] %vm504_vm2, %v5206_v31 }
  0x1d   :  { %4616 = vmatmul.mubr.msk.f32.gmra.mrb[10].mxu0 %vm77_vm0, %v62_v41  ;;  %v4212_v26 = vld [vmem:[%s7066_s9 + $0x2d8] sm:$0xff]  ;;  %v4211_v27 = vld [vmem:[%s7066_s9 + $0x2d0] sm:$0xff]  ;;  %v4214_v28 = vld [vmem:[%s7066_s9 + $0x2e8] sm:$0xff]  ;;  %514 = vst.msk [vmem:[#allocation2 + $0x48] sm:$0xff] %vm504_vm2, %v5206_v31 }
  0x1e   :  { %1653 = vperm.xlu1 %5172, %v4144_v42   ;;  %4618 = vmatprep.mubr.msk.f32.mxu0 %vm77_vm0, %v63_v43  ;;  %v4213_v29 = vld [vmem:[%s7066_s9 + $0x2e0] sm:$0xff]  ;;  %v4216_v30 = vld [vmem:[%s7066_s9 + $0x2f8] sm:$0xff]  ;;  %515 = vst.msk [vmem:[#allocation2 + $0x50] sm:$0xff] %vm504_vm2, %v5206_v31  ;;  %516 = vst.msk [vmem:[#allocation2 + $0x58] sm:$0xff] %vm504_vm2, %v5206_v31 }
  0x1f   :  { %1648 = vperm.xlu0 %5171, %v4143_v44   ;;  %517 = vst.msk [vmem:[#allocation2 + $0x60] sm:$0xff] %vm504_vm2, %v5206_v31  ;;  %518 = vst.msk [vmem:[#allocation2 + $0x68] sm:$0xff] %vm504_vm2, %v5206_v31  ;;  %v4215_v32 = vld [vmem:[%s7066_s9 + $0x2f0] sm:$0xff]  ;;  %v4237_v33 = vld [vmem:[%s7066_s9 + $0x300] sm:$0xff] }
  0x20   :  { %519 = vst.msk [vmem:[#allocation2 + $0x70] sm:$0xff] %vm504_vm2, %v5206_v31  ;;  %520 = vst.msk [vmem:[#allocation2 + $0x78] sm:$0xff] %vm504_vm2, %v5206_v31  ;;  %v4040_v34 = vld [vmem:[%s7066_s9 + $0x80] sm:$0xff]  ;;  %v4238_v35 = vld [vmem:[%s7066_s9 + $0x308] sm:$0xff] }
  0x21   :  { %4619 = vmatmul.mubr.msk.f32.gmra.mrb[12].mxu0 %vm77_vm0, %v64_v45  ;;  %521 = vst.msk [vmem:[#allocation2 + $0x80] sm:$0xff] %vm504_vm2, %v5206_v31  ;;  %522 = vst.msk [vmem:[#allocation2 + $0x88] sm:$0xff] %vm504_vm2, %v5206_v31  ;;  %v4041_v36 = vld [vmem:[%s7066_s9 + $0x88] sm:$0xff]  ;;  %v4239_v37 = vld [vmem:[%s7066_s9 + $0x310] sm:$0xff] }
  0x22   :  { %1928 = vperm.xlu1 %5172, %v4166_v46   ;;  %4621 = vmatprep.mubr.msk.f32.mxu0 %vm77_vm0, %v65_v47  ;;  %v4042_v38 = vld [vmem:[%s7066_s9 + $0x90] sm:$0xff]  ;;  %v4240_v39 = vld [vmem:[%s7066_s9 + $0x318] sm:$0xff]  ;;  %v4241_v41 = vld [vmem:[%s7066_s9 + $0x320] sm:$0xff]  ;;  %524 = vst.msk [vmem:[#allocation2 + $0x90] sm:$0x3] %vm523_vm4, %v5206_v31 }
  0x23   :  { %1923 = vperm.xlu0 %5171, %v4165_v48   ;;  %v4043_v40 = vld [vmem:[%s7066_s9 + $0x98] sm:$0xff]  ;;  %v4044_v42 = vld [vmem:[%s7066_s9 + $0xa0] sm:$0xff]  ;;  %v4242_v43 = vld [vmem:[%s7066_s9 + $0x328] sm:$0xff] }
  0x24   :  { %v4045_v44 = vld [vmem:[%s7066_s9 + $0xa8] sm:$0xff]  ;;  %v4243_v45 = vld [vmem:[%s7066_s9 + $0x330] sm:$0xff]  ;;  %v4244_v47 = vld [vmem:[%s7066_s9 + $0x338] sm:$0xff] }
  0x25   :  { %4622 = vmatmul.mubr.msk.f32.gmra.mrb[14].mxu0 %vm77_vm0, %v66_v49  ;;  %v4046_v46 = vld [vmem:[%s7066_s9 + $0xb0] sm:$0xff]  ;;  %v4047_v48 = vld [vmem:[%s7066_s9 + $0xb8] sm:$0xff]  ;;  %v4245_v49 = vld [vmem:[%s7066_s9 + $0x340] sm:$0xff] }
  0x26   :  { %1938 = vperm.xlu1 %5172, %v4168_v50   ;;  %4640 = vmatprep.mubr.msk.f32.mxu0 %vm271_vm1, %v35_v51  ;;  %v4048_v50 = vld [vmem:[%s7066_s9 + $0xc0] sm:$0xff] }
  0x27   :  { %1933 = vperm.xlu0 %5171, %v4167_v52   ;;  %v4309_v31 = vld [vmem:[%s7066_s9 + $0x400] sm:$0xff] }
  0x29   :  { %4641 = vmatmul.mubr.msk.f32.vlgmr.msra.gmra.mrb[0].mxu0 %vm271_vm1, %v36_v53  ;;  %v4246_v53 = vld [vmem:[%s7066_s9 + $0x348] sm:$0xff] }
  0x2a   :  { %1948 = vperm.xlu1 %5172, %v4170_v54   ;;  %4643 = vmatprep.mubr.msk.f32.mxu0 %vm271_vm1, %v37_v55  ;;  %v4056_v54 = vld [vmem:[%s7071_s5 + $0x18] sm:$0xff]  ;;  %v4057_v55 = vld [vmem:[%s7071_s5 + $0x20] sm:$0xff] }
  0x2b   :  { %1943 = vperm.xlu0 %5171, %v4169_v56   ;;  %v4049_v56 = vld [vmem:[%s7066_s9 + $0xc8] sm:$0xff] }
  0x2d   :  { %4644 = vmatmul.mubr.msk.f32.gmra.mrb[2].mxu0 %vm271_vm1, %v38_v57  ;;  %v4984_v57 = vpack.c.bf16 %v4057_v55, %v4056_v54  ;;  %v4278_v54 = vld [vmem:[%s7066_s9 + $0x3a8] sm:$0xff] }
  0x2e   :  { %1958 = vperm.xlu1 %5172, %v4172_v58   ;;  %4646 = vmatprep.mubr.msk.f32.mxu0 %vm271_vm1, %v39_v59  ;;  %v4145_v58 = vld [vmem:[%s7071_s5 + $0x48] sm:$0xff]  ;;  %v4146_v59 = vld [vmem:[%s7071_s5 + $0x50] sm:$0xff] }
  0x2f   :  { %1953 = vperm.xlu0 %5171, %v4171_v60   ;;  %4985 = vmatprep.subr.bf16.mxu0 %v4984_v57  ;;  %v562_v55 = vld [vmem:[%s7066_s9 + $0x28] sm:$0xff] }
  0x30   :  { %4987 = vmatpush3.bf16.msra.mxu0 %v4984_v57 }
  0x31   :  { %4647 = vmatmul.mubr.msk.f32.gmra.mrb[4].mxu0 %vm271_vm1, %v40_v61  ;;  %v4996_v61 = vpack.c.bf16 %v4146_v59, %v4145_v58  ;;  %v4279_v58 = vld [vmem:[%s7066_s9 + $0x3b0] sm:$0xff] }
  0x32   :  { %1968 = vperm.xlu1 %5172, %v4174_v62   ;;  %4649 = vmatprep.mubr.msk.f32.mxu0 %vm271_vm1, %v41_v63  ;;  %v4247_v63 = vld [vmem:[%s7066_s9 + $0x350] sm:$0xff] }
  0x33   :  { %1963 = vperm.xlu0 %5171, %v4173_v0   ;;  %v4050_v0 = vld [vmem:[%s7066_s9 + $0xd0] sm:$0xff]  ;;  %4997 = vmatprep.subr.bf16.mxu1 %v4996_v61 }
  0x34   :  { %4999 = vmatpush3.bf16.msra.mxu1 %v4996_v61  ;;  %v563_v59 = vld [vmem:[%s7066_s9 + $0x30] sm:$0xff] }
  0x35   :  { %4650 = vmatmul.mubr.msk.f32.gmra.mrb[6].mxu0 %vm271_vm1, %v42_v1 }
  0x36   :  { %1978 = vperm.xlu1 %5172, %v4176_v2   ;;  %4652 = vmatprep.mubr.msk.f32.mxu0 %vm271_vm1, %v43_v3  ;;  %v4058_v2 = vld [vmem:[%s7071_s5 + $0x28] sm:$0xf] }
  0x37   :  { %1973 = vperm.xlu0 %5171, %v4175_v4   ;;  %4668 = vmatprep.subr.msk.mxu0 %vm853_vm3, %v4058_v2  ;;  %v4147_v4 = vld [vmem:[%s7071_s5 + $0x58] sm:$0xf] }
  0x38   :  { %4669 = vmatpush3.msk.msra.mxu0 %vm853_vm3, %v4058_v2  ;;  %4758 = vmatprep.subr.msk.mxu1 %vm853_vm3, %v4147_v4  ;;  %v564_v2 = vld [vmem:[%s7066_s9 + $0x38] sm:$0xff] }
  0x39   :  { %4653 = vmatmul.mubr.msk.f32.gmra.mrb[8].mxu0 %vm271_vm1, %v44_v5  ;;  %v4248_v5 = vld [vmem:[%s7066_s9 + $0x358] sm:$0xff]  ;;  %4759 = vmatpush3.msk.msra.mxu1 %vm853_vm3, %v4147_v4 }
  0x3a   :  { %1988 = vperm.xlu1 %5172, %v4178_v6   ;;  %4655 = vmatprep.mubr.msk.f32.mxu0 %vm271_vm1, %v45_v7  ;;  %v4051_v6 = vld [vmem:[%s7066_s9 + $0xd8] sm:$0xff] }
  0x3b   :  { %1983 = vperm.xlu0 %5171, %v4177_v8  }
  0x3d   :  { %4656 = vmatmul.mubr.msk.f32.gmra.mrb[10].mxu0 %vm271_vm1, %v46_v9  ;;  %v4249_v9 = vld [vmem:[%s7066_s9 + $0x360] sm:$0xff] }
  0x3e   :  { %1998 = vperm.xlu1 %5172, %v4180_v10   ;;  %4658 = vmatprep.mubr.msk.f32.mxu0 %vm271_vm1, %v47_v11  ;;  %v4052_v10 = vld [vmem:[%s7066_s9 + $0xe0] sm:$0xff] }
  0x3f   :  { %1993 = vperm.xlu0 %5171, %v4179_v12  }
  0x41   :  { %4659 = vmatmul.mubr.msk.f32.gmra.mrb[12].mxu0 %vm271_vm1, %v48_v13  ;;  %v4181_v13 = vld [vmem:[%s7071_s5 + $0x60] sm:$0xff] }
  0x42   :  { %2273 = vperm.xlu1 %5172, %v4202_v14   ;;  %4661 = vmatprep.mubr.msk.f32.mxu0 %vm271_vm1, %v49_v15  ;;  %v4182_v14 = vld [vmem:[%s7071_s5 + $0x68] sm:$0xff] }
  0x43   :  { %2268 = vperm.xlu0 %5171, %v4201_v16   ;;  %v4250_v15 = vld [vmem:[%s7066_s9 + $0x368] sm:$0xff]  ;;  %v5730_v16 = vpack.c.bf16 %v4182_v14, %v4181_v13 }
  0x44   :  { %v4282_v14 = vld [vmem:[%s7066_s9 + $0x3c8] sm:$0xff] }
  0x45   :  { %4662 = vmatmul.mubr.msk.f32.gmra.mrb[14].mxu0 %vm271_vm1, %v50_v17  ;;  %v4053_v17 = vld [vmem:[%s7066_s9 + $0xe8] sm:$0xff]  ;;  %5001 = vmatprep.subr.bf16.mxu1 %v5730_v16 }
  0x46   :  { %2283 = vperm.xlu1 %5172, %v4204_v18  }
  0x47   :  { %2278 = vperm.xlu0 %5171, %v4203_v19  }
  0x4a   :  { %2293 = vperm.xlu1 %5172, %v4206_v20   ;;  %v4251_v20 = vld [vmem:[%s7066_s9 + $0x370] sm:$0xff] }
  0x4b   :  { %2288 = vperm.xlu0 %5171, %v4205_v21   ;;  %v4054_v21 = vld [vmem:[%s7066_s9 + $0xf0] sm:$0xff] }
  0x4e   :  { %2303 = vperm.xlu1 %5172, %v4208_v22  }
  0x4f   :  { %2298 = vperm.xlu0 %5171, %v4207_v23  }
  0x52   :  { %2313 = vperm.xlu1 %5172, %v4210_v24   ;;  %v4252_v24 = vld [vmem:[%s7066_s9 + $0x378] sm:$0xff] }
  0x53   :  { %2308 = vperm.xlu0 %5171, %v4209_v25   ;;  %v4055_v25 = vld [vmem:[%s7066_s9 + $0xf8] sm:$0xff] }
  0x56   :  { %2323 = vperm.xlu1 %5172, %v4212_v26  }
  0x57   :  { %2318 = vperm.xlu0 %5171, %v4211_v27  }
  0x5a   :  { %2333 = vperm.xlu1 %5172, %v4214_v28   ;;  %v4273_v28 = vld [vmem:[%s7066_s9 + $0x380] sm:$0xff] }
  0x5b   :  { %2328 = vperm.xlu0 %5171, %v4213_v29   ;;  %v557_v29 = vld [vmem:[%s7066_s9] sm:$0xff] }
  0x5e   :  { %2343 = vperm.xlu1 %5172, %v4216_v30  }
  0x5f   :  { %2338 = vperm.xlu0 %5171, %v4215_v32  }
  0x62   :  { %2613 = vperm.xlu1 %5172, %v4237_v33   ;;  %v4274_v33 = vld [vmem:[%s7066_s9 + $0x388] sm:$0xff] }
  0x63   :  { %707 = vperm.xlu0 %5171, %v4040_v34   ;;  %v558_v34 = vld [vmem:[%s7066_s9 + $0x8] sm:$0xff] }
  0x66   :  { %2618 = vperm.xlu1 %5172, %v4238_v35   ;;  %v669_v35 = vld [vmem:[%s7071_s5] sm:$0xff] }
  0x67   :  { %712 = vperm.xlu0 %5171, %v4041_v36   ;;  %v670_v36 = vld [vmem:[%s7071_s5 + $0x8] sm:$0xff] }
  0x6a   :  { %2623 = vperm.xlu1 %5172, %v4239_v37  }
  0x6b   :  { %717 = vperm.xlu0 %5171, %v4042_v38   ;;  %v5784_v38 = vpack.c.bf16 %v670_v36, %v669_v35  ;;  %v4285_v36 = vld [vmem:[%s7066_s9 + $0x3e0] sm:$0xff] }
  0x6d   :  { %4989 = vmatprep.subr.bf16.mxu0 %v5784_v38 }
  0x6e   :  { %2628 = vperm.xlu1 %5172, %v4240_v39  }
  0x6f   :  { %722 = vperm.xlu0 %5171, %v4043_v40   ;;  %v4275_v40 = vld [vmem:[%s7066_s9 + $0x390] sm:$0xff] }
  0x72   :  { %2633 = vperm.xlu1 %5172, %v4241_v41   ;;  %v559_v41 = vld [vmem:[%s7066_s9 + $0x10] sm:$0xff] }
  0x73   :  { %727 = vperm.xlu0 %5171, %v4044_v42  }
  0x76   :  { %2638 = vperm.xlu1 %5172, %v4242_v43  }
  0x77   :  { %732 = vperm.xlu0 %5171, %v4045_v44   ;;  %v4276_v44 = vld [vmem:[%s7066_s9 + $0x398] sm:$0xff] }
  0x7a   :  { %2643 = vperm.xlu1 %5172, %v4243_v45   ;;  %v560_v45 = vld [vmem:[%s7066_s9 + $0x18] sm:$0xff] }
  0x7b   :  { %737 = vperm.xlu0 %5171, %v4046_v46  }
  0x7e   :  { %2648 = vperm.xlu1 %5172, %v4244_v47  }
  0x7f   :  { %742 = vperm.xlu0 %5171, %v4047_v48   ;;  %v4277_v48 = vld [vmem:[%s7066_s9 + $0x3a0] sm:$0xff] }
  0x81   :  { %v5655_v51 = vpop.permute.xlu1 %1588  ;;  %v5657_v52 = vpop.permute.xlu0 %1578 }
  0x82   :  { %2653 = vperm.xlu1 %5172, %v4245_v49   ;;  %v561_v49 = vld [vmem:[%s7066_s9 + $0x20] sm:$0xff] }
  0x83   :  { %747 = vperm.xlu0 %5171, %v4048_v50  }
  0x85   :  { %v5677_v60 = vpop.permute.xlu1 %1593 }
  0x86   :  { %v5679_v62 = vpop.permute.xlu0 %1583  ;;  %2658 = vperm.xlu1 %5172, %v4246_v53  }
  0x87   :  { %752 = vperm.xlu0 %5171, %v4049_v56  }
  0x89   :  { %v5687_v1 = vpop.permute.xlu1 %1603 }
  0x8a   :  { %v5692_v3 = vpop.permute.xlu0 %1598  ;;  %2663 = vperm.xlu1 %5172, %v4247_v63  }
  0x8b   :  { %757 = vperm.xlu0 %5171, %v4050_v0   ;;  %v4280_v0 = vld [vmem:[%s7066_s9 + $0x3b8] sm:$0xff] }
  0x8d   :  { %v5706_v7 = vpop.permute.xlu1 %1613 }
  0x8e   :  { %v5709_v8 = vpop.permute.xlu0 %1608  ;;  %2668 = vperm.xlu1 %5172, %v4248_v5  }
  0x8f   :  { %762 = vperm.xlu0 %5171, %v4051_v6   ;;  %v4281_v6 = vld [vmem:[%s7066_s9 + $0x3c0] sm:$0xff] }
  0x91   :  { %v5717_v11 = vpop.permute.xlu1 %1623 }
  0x92   :  { %v5719_v12 = vpop.permute.xlu0 %1618  ;;  %2673 = vperm.xlu1 %5172, %v4249_v9   ;;  %v565_v9 = vld [vmem:[%s7066_s9 + $0x40] sm:$0xff] }
  0x93   :  { %767 = vperm.xlu0 %5171, %v4052_v10  }
  0x95   :  { %v5735_v18 = vpop.permute.xlu1 %1633 }
  0x96   :  { %v5738_v19 = vpop.permute.xlu0 %1628  ;;  %2678 = vperm.xlu1 %5172, %v4250_v15   ;;  %v566_v15 = vld [vmem:[%s7066_s9 + $0x48] sm:$0xff] }
  0x97   :  { %772 = vperm.xlu0 %5171, %v4053_v17  }
  0x99   :  { %v5746_v22 = vpop.permute.xlu1 %1643 }
  0x9a   :  { %v5748_v23 = vpop.permute.xlu0 %1638  ;;  %2683 = vperm.xlu1 %5172, %v4251_v20  }
  0x9b   :  { %777 = vperm.xlu0 %5171, %v4054_v21   ;;  %v4283_v21 = vld [vmem:[%s7066_s9 + $0x3d0] sm:$0xff] }
  0x9d   :  { %v5756_v26 = vpop.permute.xlu1 %1653 }
  0x9e   :  { %v5758_v27 = vpop.permute.xlu0 %1648  ;;  %2688 = vperm.xlu1 %5172, %v4252_v24   ;;  %v567_v24 = vld [vmem:[%s7066_s9 + $0x50] sm:$0xff] }
  0x9f   :  { %782 = vperm.xlu0 %5171, %v4055_v25  }
  0xa1   :  { %v5766_v30 = vpop.permute.xlu1 %1928 }
  0xa2   :  { %v5768_v32 = vpop.permute.xlu0 %1923  ;;  %2958 = vperm.xlu1 %5172, %v4273_v28  }
  0xa3   :  { %575 = vperm.xlu0 %5171, %v557_v29   ;;  %v4284_v29 = vld [vmem:[%s7066_s9 + $0x3d8] sm:$0xff] }
  0xa5   :  { %v5782_v37 = vpop.permute.xlu1 %1938 }
  0xa6   :  { %v5786_v39 = vpop.permute.xlu0 %1933  ;;  %2963 = vperm.xlu1 %5172, %v4274_v33   ;;  %v568_v33 = vld [vmem:[%s7066_s9 + $0x58] sm:$0xff] }
  0xa7   :  { %580 = vperm.xlu0 %5171, %v558_v34  }
  0xa9   :  { %v5795_v42 = vpop.permute.xlu1 %1948 }
  0xaa   :  { %v5797_v43 = vpop.permute.xlu0 %1943  ;;  %2968 = vperm.xlu1 %5172, %v4275_v40   ;;  %v569_v40 = vld [vmem:[%s7066_s9 + $0x60] sm:$0xff] }
  0xab   :  { %585 = vperm.xlu0 %5171, %v559_v41  }
  0xad   :  { %v5805_v46 = vpop.permute.xlu1 %1958 }
  0xae   :  { %v5807_v47 = vpop.permute.xlu0 %1953  ;;  %2973 = vperm.xlu1 %5172, %v4276_v44  }
  0xaf   :  { %590 = vperm.xlu0 %5171, %v560_v45   ;;  %v4286_v45 = vld [vmem:[%s7066_s9 + $0x3e8] sm:$0xff] }
  0xb1   :  { %v5815_v50 = vpop.permute.xlu1 %1968 }
  0xb2   :  { %v5817_v53 = vpop.permute.xlu0 %1963  ;;  %2978 = vperm.xlu1 %5172, %v4277_v48   ;;  %v570_v48 = vld [vmem:[%s7066_s9 + $0x68] sm:$0xff] }
  0xb3   :  { %595 = vperm.xlu0 %5171, %v561_v49  }
  0xb5   :  { %v5825_v56 = vpop.permute.xlu1 %1978 }
  0xb6   :  { %7085 = vst [vmem:[#allocation3_spill] sm:$0xff] %v5825_v56  ;;  %v5827_v57 = vpop.permute.xlu0 %1973  ;;  %2983 = vperm.xlu1 %5172, %v4278_v54  }
  0xb7   :  { %7086 = vst [vmem:[#allocation4_spill] sm:$0xff] %v5827_v57  ;;  %600 = vperm.xlu0 %5171, %v562_v55   ;;  %v4287_v55 = vld [vmem:[%s7066_s9 + $0x3f0] sm:$0xff] }
  0xb8   :  { %v4109_v57 = vld [vmem:[%s7071_s5 + $0x30] sm:$0xff] }
  0xb9   :  { %v5835_v61 = vpop.permute.xlu1 %1988 }
  0xba   :  { %7087 = vst [vmem:[#allocation5_spill] sm:$0xff] %v5835_v61  ;;  %v5837_v63 = vpop.permute.xlu0 %1983  ;;  %2988 = vperm.xlu1 %5172, %v4279_v58   ;;  %v571_v58 = vld [vmem:[%s7066_s9 + $0x70] sm:$0xff] }
  0xbb   :  { %7088 = vst [vmem:[#allocation6_spill] sm:$0xff] %v5837_v63  ;;  %605 = vperm.xlu0 %5171, %v563_v59  }
  0xbd   :  { %v5845_v4 = vpop.permute.xlu1 %1998 }
  0xbe   :  { %7089 = vst [vmem:[#allocation7_spill] sm:$0xff] %v5845_v4  ;;  %v5847_v5 = vpop.permute.xlu0 %1993  ;;  %2993 = vperm.xlu1 %5172, %v4280_v0  }
  0xbf   :  { %7090 = vst [vmem:[#allocation8_spill] sm:$0xff] %v5847_v5  ;;  %610 = vperm.xlu0 %5171, %v564_v2   ;;  %v4288_v2 = vld [vmem:[%s7066_s9 + $0x3f8] sm:$0xff] }
  0xc1   :  { %v5855_v10 = vpop.permute.xlu1 %2273 }
  0xc2   :  { %7091 = vst [vmem:[#allocation9_spill] sm:$0xff] %v5855_v10  ;;  %v5857_v13 = vpop.permute.xlu0 %2268  ;;  %2998 = vperm.xlu1 %5172, %v4281_v6   ;;  %v572_v6 = vld [vmem:[%s7066_s9 + $0x78] sm:$0xff] }
  0xc3   :  { %7092 = vst [vmem:[#allocation10_spill] sm:$0xff] %v5857_v13  ;;  %615 = vperm.xlu0 %5171, %v565_v9  }
  0xc5   :  { %v5865_v17 = vpop.permute.xlu1 %2283 }
  0xc6   :  { %7093 = vst [vmem:[#allocation11_spill] sm:$0xff] %v5865_v17  ;;  %v5867_v20 = vpop.permute.xlu0 %2278  ;;  %3003 = vperm.xlu1 %5172, %v4282_v14  }
  0xc7   :  { %7094 = vst [vmem:[#allocation12_spill] sm:$0xff] %v5867_v20  ;;  %620 = vperm.xlu0 %5171, %v566_v15   ;;  %v672_v15 = vld [vmem:[#allocation2 + $0x1] sm:$0xff] }
  0xc9   :  { %v5875_v25 = vpop.permute.xlu1 %2293 }
  0xca   :  { %7095 = vst [vmem:[#allocation13_spill] sm:$0xff] %v5875_v25  ;;  %v5877_v28 = vpop.permute.xlu0 %2288  ;;  %3008 = vperm.xlu1 %5172, %v4283_v21   ;;  %v4093_v21 = vld [vmem:[%s7066_s9 + $0x100] sm:$0xff] }
  0xcb   :  { %7096 = vst [vmem:[#allocation14_spill] sm:$0xff] %v5877_v28  ;;  %625 = vperm.xlu0 %5171, %v567_v24  }
  0xcd   :  { %v5885_v34 = vpop.permute.xlu1 %2303 }
  0xce   :  { %7097 = vst [vmem:[#allocation15_spill] sm:$0xff] %v5885_v34  ;;  %v5887_v35 = vpop.permute.xlu0 %2298  ;;  %3013 = vperm.xlu1 %5172, %v4284_v29  }
  0xcf   :  { %7098 = vst [vmem:[#allocation16_spill] sm:$0xff] %v5887_v35  ;;  %630 = vperm.xlu0 %5171, %v568_v33  }
  0xd1   :  { %v5895_v41 = vpop.permute.xlu1 %2313 }
  0xd2   :  { %7099 = vst [vmem:[#allocation17_spill] sm:$0xff] %v5895_v41  ;;  %v5897_v44 = vpop.permute.xlu0 %2308  ;;  %3018 = vperm.xlu1 %5172, %v4285_v36   ;;  %v4310_v36 = vld [vmem:[%s7066_s9 + $0x408] sm:$0xff] }
  0xd3   :  { %7100 = vst [vmem:[#allocation18_spill] sm:$0xff] %v5897_v44  ;;  %635 = vperm.xlu0 %5171, %v569_v40   ;;  %v4094_v40 = vld [vmem:[%s7066_s9 + $0x108] sm:$0xff] }
  0xd5   :  { %v5905_v49 = vpop.permute.xlu1 %2323 }
  0xd6   :  { %7101 = vst [vmem:[#allocation19_spill] sm:$0xff] %v5905_v49  ;;  %v5907_v54 = vpop.permute.xlu0 %2318  ;;  %3023 = vperm.xlu1 %5172, %v4286_v45  }
  0xd7   :  { %7102 = vst [vmem:[#allocation20_spill] sm:$0xff] %v5907_v54  ;;  %640 = vperm.xlu0 %5171, %v570_v48  }
  0xd9   :  { %v5915_v59 = vpop.permute.xlu1 %2333 }
  0xda   :  { %7103 = vst [vmem:[#allocation21_spill] sm:$0xff] %v5915_v59  ;;  %v5918_v0 = vpop.permute.xlu0 %2328  ;;  %3028 = vperm.xlu1 %5172, %v4287_v55   ;;  %v4311_v55 = vld [vmem:[%s7066_s9 + $0x410] sm:$0xff]  ;;  %v4317_v59 = vld [vmem:[%s7066_s9 + $0x440] sm:$0xff] }
  0xdb   :  { %7104 = vst [vmem:[#allocation22_spill] sm:$0xff] %v5918_v0  ;;  %645 = vperm.xlu0 %5171, %v571_v58   ;;  %v4095_v58 = vld [vmem:[%s7066_s9 + $0x110] sm:$0xff] }
  0xdd   :  { %v5926_v9 = vpop.permute.xlu1 %2343 }
  0xde   :  { %7105 = vst [vmem:[#allocation23_spill] sm:$0xff] %v5926_v9  ;;  %v5928_v14 = vpop.permute.xlu0 %2338  ;;  %3033 = vperm.xlu1 %5172, %v4288_v2  }
  0xdf   :  { %7106 = vst [vmem:[#allocation24_spill] sm:$0xff] %v5928_v14  ;;  %650 = vperm.xlu0 %5171, %v572_v6  }
  0xe1   :  { %v5936_v24 = vpop.permute.xlu1 %2613 }
  0xe2   :  { %7107 = vst [vmem:[#allocation25_spill] sm:$0xff] %v5936_v24  ;;  %v708_v29 = vpop.permute.xlu0 %707  ;;  %3303 = vperm.xlu1 %5172, %v4309_v31   ;;  %v4312_v31 = vld [vmem:[%s7066_s9 + $0x418] sm:$0xff] }
  0xe3   :  { %v785_v33 = vmul.f32 %v708_v29, %v672_v15  ;;  %1233 = vperm.xlu0 %5171, %v4093_v21   ;;  %v4096_v15 = vld [vmem:[%s7066_s9 + $0x118] sm:$0xff] }
  0xe5   :  { %4670 = vmatprep.mubr.msk.f32.mxu0 %vm504_vm2, %v785_v33  ;;  %v5945_v45 = vpop.permute.xlu1 %2618  ;;  %v4313_v33 = vld [vmem:[%s7066_s9 + $0x420] sm:$0xff] }
  0xe6   :  { %7108 = vst [vmem:[#allocation26_spill] sm:$0xff] %v5945_v45  ;;  %v5947_v48 = vpop.permute.xlu0 %712  ;;  %3308 = vperm.xlu1 %5172, %v4310_v36   ;;  %v4097_v36 = vld [vmem:[%s7066_s9 + $0x120] sm:$0xff]  ;;  %v4100_v45 = vld [vmem:[%s7066_s9 + $0x138] sm:$0xff] }
  0xe7   :  { %1238 = vperm.xlu0 %5171, %v4094_v40  }
  0xe9   :  { %v5955_v2 = vpop.permute.xlu1 %2623 }
  0xea   :  { %7109 = vst [vmem:[#allocation27_spill] sm:$0xff] %v5955_v2  ;;  %v5957_v6 = vpop.permute.xlu0 %717  ;;  %3313 = vperm.xlu1 %5172, %v4311_v55  }
  0xeb   :  { %1243 = vperm.xlu0 %5171, %v4095_v58   ;;  %v4314_v58 = vld [vmem:[%s7066_s9 + $0x428] sm:$0xff] }
  0xed   :  { %v5965_v21 = vpop.permute.xlu1 %2628 }
  0xee   :  { %7110 = vst [vmem:[#allocation28_spill] sm:$0xff] %v5965_v21  ;;  %v5967_v29 = vpop.permute.xlu0 %722  ;;  %3318 = vperm.xlu1 %5172, %v4312_v31   ;;  %v4098_v31 = vld [vmem:[%s7066_s9 + $0x128] sm:$0xff] }
  0xef   :  { %1248 = vperm.xlu0 %5171, %v4096_v15  }
  0xf1   :  { %v5975_v40 = vpop.permute.xlu1 %2633 }
  0xf2   :  { %7111 = vst [vmem:[#allocation29_spill] sm:$0xff] %v5975_v40  ;;  %v5977_v55 = vpop.permute.xlu0 %727  ;;  %3323 = vperm.xlu1 %5172, %v4313_v33   ;;  %v4315_v40 = vld [vmem:[%s7066_s9 + $0x430] sm:$0xff] }
  0xf3   :  { %1253 = vperm.xlu0 %5171, %v4097_v36   ;;  %v4099_v33 = vld [vmem:[%s7066_s9 + $0x130] sm:$0xff] }
  0xf5   :  { %v5985_v15 = vpop.permute.xlu1 %2638 }
  0xf6   :  { %7112 = vst [vmem:[#allocation30_spill] sm:$0xff] %v5985_v15  ;;  %v5987_v21 = vpop.permute.xlu0 %732  ;;  %3328 = vperm.xlu1 %5172, %v4314_v58   ;;  %v6002_v15 = vld [vmem:[%s7072_s4] ss:$0 sm:$0xff]  ;;  %v4316_v58 = vld [vmem:[%s7066_s9 + $0x438] sm:$0xff] }
  0xf7   :  { %1258 = vperm.xlu0 %5171, %v4098_v31  }
  0xf9   :  { %v5995_v36 = vpop.permute.xlu1 %2643 }
  0xfa   :  { %7113 = vst [vmem:[#allocation31_spill] sm:$0xff] %v5995_v36  ;;  %v5997_v2 = vpop.permute.xlu0 %737  ;;  %3333 = vperm.xlu1 %5172, %v4315_v40  }
  0xfb   :  { %1263 = vperm.xlu0 %5171, %v4099_v33  }
  0xfc   :  { %v4642_v31 = vpop.f32.mrb[0].mxu0 }
  0xfd   :  { %v473_v36 = vadd.f32 %v4642_v31, %v6002_v15  ;;  %v386_v24 = vpop.f32.mrb[1].mxu0  ;;  %v6011_v9 = vpop.permute.xlu1 %2648  ;;  %v4101_v31 = vld [vmem:[%s7066_s9 + $0x140] sm:$0xff] }
  0xfe   :  { %v472_v40 = vadd.f32 %v6002_v15, %v386_v24  ;;  %v6014_v14 = vpop.permute.xlu0 %742  ;;  %3338 = vperm.xlu1 %5172, %v4316_v58  }
  0xff   :  { %v489_v33 = vmax.f32 %v473_v36, 0.0  ;;  %1268 = vperm.xlu0 %5171, %v4100_v45  }
 0x100   :  { %v488_v0 = vmax.f32 %v472_v40, 0.0  ;;  %v4645_v49 = vpop.f32.mrb[2].mxu0  ;;  %v4318_v40 = vld [vmem:[%s7066_s9 + $0x448] sm:$0xff] }
 0x101   :  { %526 = vst.msk [vmem:[#allocation2 + $0x11] sm:$0xff] %vm504_vm2, %v489_v33  ;;  %v475_v54 = vadd.f32 %v4645_v49, %v6002_v15  ;;  %v396_v24 = vpop.f32.mrb[3].mxu0  ;;  %v6024_v41 = vpop.permute.xlu1 %2653  ;;  %v4102_v49 = vld [vmem:[%s7066_s9 + $0x148] sm:$0xff] }
 0x102   :  { %525 = vst.msk [vmem:[#allocation2 + $0x9] sm:$0xff] %vm504_vm2, %v488_v0  ;;  %v474_v45 = vadd.f32 %v6002_v15, %v396_v24  ;;  %v6028_v36 = vpop.permute.xlu0 %747  ;;  %3343 = vperm.xlu1 %5172, %v4317_v59  }
 0x103   :  { %v491_v58 = vmax.f32 %v475_v54, 0.0  ;;  %1273 = vperm.xlu0 %5171, %v4101_v31  }
 0x104   :  { %v490_v44 = vmax.f32 %v474_v45, 0.0  ;;  %v4648_v33 = vpop.f32.mrb[4].mxu0  ;;  %v4319_v45 = vld [vmem:[%s7066_s9 + $0x450] sm:$0xff] }
 0x105   :  { %528 = vst.msk [vmem:[#allocation2 + $0x21] sm:$0xff] %vm504_vm2, %v491_v58  ;;  %v477_v0 = vadd.f32 %v4648_v33, %v6002_v15  ;;  %v406_v24 = vpop.f32.mrb[5].mxu0  ;;  %v6038_v34 = vpop.permute.xlu1 %2658  ;;  %v4103_v33 = vld [vmem:[%s7066_s9 + $0x150] sm:$0xff] }
 0x106   :  { %527 = vst.msk [vmem:[#allocation2 + $0x19] sm:$0xff] %vm504_vm2, %v490_v44  ;;  %v476_v54 = vadd.f32 %v6002_v15, %v406_v24  ;;  %v6042_v59 = vpop.permute.xlu0 %752  ;;  %3348 = vperm.xlu1 %5172, %v4318_v40  }
 0x107   :  { %v493_v31 = vmax.f32 %v477_v0, 0.0  ;;  %1278 = vperm.xlu0 %5171, %v4102_v49  }
 0x108   :  { %v492_v35 = vmax.f32 %v476_v54, 0.0  ;;  %v4651_v58 = vpop.f32.mrb[6].mxu0  ;;  %v6050_v25 = vld [vmem:[#allocation2 + $0x11] sm:$0xff] }
 0x109   :  { %530 = vst.msk [vmem:[#allocation2 + $0x31] sm:$0xff] %vm504_vm2, %v493_v31  ;;  %v479_v44 = vadd.f32 %v4651_v58, %v6002_v15  ;;  %v416_v24 = vpop.f32.mrb[7].mxu0  ;;  %v6054_v40 = vpop.permute.xlu1 %2663  ;;  %v6056_v49 = vld [vmem:[#allocation2 + $0x9] sm:$0xff]  ;;  %v787_v13 = vmul.f32 %v5957_v6, %v6050_v25 }
 0x10a   :  { %v6058_v0 = vld [vmem:[#allocation2 + $0x8] sm:$0xff]  ;;  %v6060_v28 = vld [vmem:[#allocation2 + $0x10] sm:$0xff]  ;;  %529 = vst.msk [vmem:[#allocation2 + $0x29] sm:$0xff] %vm504_vm2, %v492_v35  ;;  %v478_v54 = vadd.f32 %v6002_v15, %v416_v24  ;;  %v6064_v17 = vpop.permute.xlu0 %757  ;;  %3353 = vperm.xlu1 %5172, %v4319_v45   ;;  %v786_v31 = vmul.f32 %v5947_v48, %v6056_v49  ;;  %v4320_v35 = vld [vmem:[%s7066_s9 + $0x458] sm:$0xff] }
 0x10b   :  { %v1656_v58 = vmul.f32 %v5657_v52, %v6058_v0  ;;  %v1657_v20 = vmul.f32 %v5679_v62, %v6060_v28  ;;  %v495_v10 = vmax.f32 %v479_v44, 0.0  ;;  %1283 = vperm.xlu0 %5171, %v4103_v33   ;;  %v4104_v52 = vld [vmem:[%s7066_s9 + $0x158] sm:$0xff]  ;;  %v4183_v48 = vld [vmem:[%s7071_s5 + $0x70] sm:$0xf] }
 0x10c   :  { %v494_v24 = vmax.f32 %v478_v54, 0.0  ;;  %v4654_v45 = vpop.f32.mrb[8].mxu0  ;;  %4671 = vmatmul.mubr.msk.f32.vlgmr.msra.gmra.mrb[16].mxu0 %vm504_vm2, %v786_v31  ;;  %v6082_v62 = vld [vmem:[#allocation2 + $0x21] sm:$0xff] }
 0x10d   :  { %4760 = vmatprep.mubr.msk.f32.mxu1 %vm504_vm2, %v1656_v58  ;;  %532 = vst.msk [vmem:[#allocation2 + $0x41] sm:$0xff] %vm504_vm2, %v495_v10  ;;  %v481_v6 = vadd.f32 %v4654_v45, %v6002_v15  ;;  %v426_v33 = vpop.f32.mrb[9].mxu0  ;;  %4673 = vmatprep.mubr.msk.f32.mxu0 %vm504_vm2, %v787_v13  ;;  %v6091_v44 = vpop.permute.xlu1 %2668  ;;  %v6093_v54 = vld [vmem:[#allocation2 + $0x19] sm:$0xff]  ;;  %v789_v5 = vmul.f32 %v5977_v55, %v6082_v62 }
 0x10e   :  { %4761 = vmatmul.mubr.msk.f32.vlgmr.msra.gmra.mrb[0].mxu1 %vm504_vm2, %v1657_v20  ;;  %v6095_v31 = vld [vmem:[#allocation2 + $0x18] sm:$0xff]  ;;  %v6097_v58 = vld [vmem:[#allocation2 + $0x20] sm:$0xff]  ;;  %531 = vst.msk [vmem:[#allocation2 + $0x39] sm:$0xff] %vm504_vm2, %v494_v24  ;;  %v480_v4 = vadd.f32 %v6002_v15, %v426_v33  ;;  %v6101_v10 = vpop.permute.xlu0 %762  ;;  %3358 = vperm.xlu1 %5172, %v4320_v35   ;;  %v788_v13 = vmul.f32 %v5967_v29, %v6093_v54 }
 0x10f   :  { %5003 = vmatpush3.bf16.msra.mxu1 %v5730_v16  ;;  %v1658_v20 = vmul.f32 %v5655_v51, %v6095_v31  ;;  %v497_v45 = vmax.f32 %v481_v6, 0.0  ;;  %1288 = vperm.xlu0 %5171, %v4104_v52   ;;  %v1659_v24 = vmul.f32 %v5677_v60, %v6097_v58  ;;  %v4321_v33 = vld [vmem:[%s7066_s9 + $0x460] sm:$0xff] }
 0x110   :  { %4788 = vmatprep.subr.msk.mxu1 %vm853_vm3, %v4183_v48  ;;  %v496_v16 = vmax.f32 %v480_v4, 0.0  ;;  %v4657_v35 = vpop.f32.mrb[10].mxu0  ;;  %4674 = vmatmul.mubr.msk.f32.gmra.mrb[18].mxu0 %vm504_vm2, %v788_v13  ;;  %v4105_v51 = vld [vmem:[%s7066_s9 + $0x160] sm:$0xff]  ;;  %v6121_v29 = vld [vmem:[#allocation2 + $0x31] sm:$0xff] }
 0x111   :  { %4763 = vmatprep.mubr.msk.f32.mxu1 %vm504_vm2, %v1658_v20  ;;  %534 = vst.msk [vmem:[#allocation2 + $0x51] sm:$0xff] %vm504_vm2, %v497_v45  ;;  %v483_v60 = vadd.f32 %v4657_v35, %v6002_v15  ;;  %v436_v55 = vpop.f32.mrb[11].mxu0  ;;  %4676 = vmatprep.mubr.msk.f32.mxu0 %vm504_vm2, %v789_v5  ;;  %v6127_v4 = vpop.permute.xlu1 %2673  ;;  %v6129_v52 = vld [vmem:[#allocation2 + $0x29] sm:$0xff]  ;;  %v791_v63 = vmul.f32 %v5997_v2, %v6121_v29 }
 0x112   :  { %4764 = vmatmul.mubr.msk.f32.gmra.mrb[2].mxu1 %vm504_vm2, %v1659_v24  ;;  %v6131_v6 = vld [vmem:[#allocation2 + $0x28] sm:$0xff]  ;;  %v6133_v13 = vld [vmem:[#allocation2 + $0x30] sm:$0xff]  ;;  %533 = vst.msk [vmem:[#allocation2 + $0x49] sm:$0xff] %vm504_vm2, %v496_v16  ;;  %v482_v20 = vadd.f32 %v6002_v15, %v436_v55  ;;  %v6137_v45 = vpop.permute.xlu0 %767  ;;  %3363 = vperm.xlu1 %5172, %v4321_v33   ;;  %v790_v5 = vmul.f32 %v5987_v21, %v6129_v52 }
 0x113   :  { %v1660_v24 = vmul.f32 %v5692_v3, %v6131_v6  ;;  %v1661_v35 = vmul.f32 %v5687_v1, %v6133_v13  ;;  %v499_v61 = vmax.f32 %v483_v60, 0.0  ;;  %1293 = vperm.xlu0 %5171, %v4105_v51   ;;  %v4322_v16 = vld [vmem:[%s7066_s9 + $0x468] sm:$0xff]  ;;  %4789 = vmatpush3.msk.msra.mxu1 %vm853_vm3, %v4183_v48 }
 0x114   :  { %v498_v33 = vmax.f32 %v482_v20, 0.0  ;;  %v4660_v55 = vpop.f32.mrb[12].mxu0  ;;  %4677 = vmatmul.mubr.msk.f32.gmra.mrb[20].mxu0 %vm504_vm2, %v790_v5  ;;  %v4106_v1 = vld [vmem:[%s7066_s9 + $0x168] sm:$0xff] }
 0x115   :  { %4766 = vmatprep.mubr.msk.f32.mxu1 %vm504_vm2, %v1660_v24  ;;  %v6156_v3 = vld [vmem:[#allocation2 + $0x41] sm:$0xff]  ;;  %536 = vst.msk [vmem:[#allocation2 + $0x61] sm:$0xff] %vm504_vm2, %v499_v61  ;;  %v485_v2 = vadd.f32 %v4660_v55, %v6002_v15  ;;  %v446_v21 = vpop.f32.mrb[13].mxu0  ;;  %4679 = vmatprep.mubr.msk.f32.mxu0 %vm504_vm2, %v791_v63  ;;  %v6162_v48 = vpop.permute.xlu1 %2678  ;;  %v6164_v51 = vld [vmem:[#allocation2 + $0x39] sm:$0xff] }
 0x116   :  { %4767 = vmatmul.mubr.msk.f32.gmra.mrb[4].mxu1 %vm504_vm2, %v1661_v35  ;;  %v6166_v60 = vld [vmem:[#allocation2 + $0x38] sm:$0xff]  ;;  %v6168_v20 = vld [vmem:[#allocation2 + $0x40] sm:$0xff]  ;;  %535 = vst.msk [vmem:[#allocation2 + $0x59] sm:$0xff] %vm504_vm2, %v498_v33  ;;  %v484_v5 = vadd.f32 %v6002_v15, %v446_v21  ;;  %v6172_v61 = vpop.permute.xlu0 %772  ;;  %3368 = vperm.xlu1 %5172, %v4322_v16   ;;  %v792_v63 = vmul.f32 %v6014_v14, %v6164_v51  ;;  %v4323_v33 = vld [vmem:[%s7066_s9 + $0x470] sm:$0xff] }
 0x117   :  { %7114 = vst [vmem:[#allocation32_spill] sm:$0xff] %v6166_v60  ;;  %7115 = vst [vmem:[#allocation33_spill] sm:$0xff] %v6168_v20  ;;  %v1662_v24 = vmul.f32 %v5709_v8, %v6166_v60  ;;  %v1663_v35 = vmul.f32 %v5706_v7, %v6168_v20  ;;  %v501_v55 = vmax.f32 %v485_v2, 0.0  ;;  %1298 = vperm.xlu0 %5171, %v4106_v1   ;;  %v4107_v16 = vld [vmem:[%s7066_s9 + $0x170] sm:$0xff]  ;;  %4991 = vmatpush3.bf16.msra.mxu0 %v5784_v38  ;;  %v4217_v1 = vld [vmem:[%s7071_s5 + $0x78] sm:$0xff] }
 0x118   :  { %v793_v56 = vmul.f32 %v6028_v36, %v6156_v3  ;;  %v671_v8 = vld [vmem:[%s7071_s5 + $0x10] sm:$0xf]  ;;  %v500_v7 = vmax.f32 %v484_v5, 0.0  ;;  %v4663_v14 = vpop.f32.mrb[14].mxu0  ;;  %4680 = vmatmul.mubr.msk.f32.gmra.mrb[22].mxu0 %vm504_vm2, %v792_v63  ;;  %v4218_v38 = vld [vmem:[%s7071_s5 + $0x80] sm:$0xff] }
 0x119   :  { %4769 = vmatprep.mubr.msk.f32.mxu1 %vm504_vm2, %v1662_v24  ;;  %v6194_v36 = vld [vmem:[#allocation2 + $0x51] sm:$0xff]  ;;  %538 = vst.msk [vmem:[#allocation2 + $0x71] sm:$0xff] %vm504_vm2, %v501_v55  ;;  %v487_v2 = vadd.f32 %v4663_v14, %v6002_v15  ;;  %v456_v21 = vpop.f32.mrb[15].mxu0  ;;  %v6206_v5 = vpop.permute.xlu1 %2683  ;;  %v6208_v63 = vld [vmem:[#allocation2 + $0x49] sm:$0xff]  ;;  %4698 = vmatprep.subr.msk.mxu0 %vm853_vm3, %v671_v8 }
 0x11a   :  { %4682 = vmatprep.mubr.msk.f32.mxu0 %vm504_vm2, %v793_v56  ;;  %4770 = vmatmul.mubr.msk.f32.gmra.mrb[6].mxu1 %vm504_vm2, %v1663_v35  ;;  %v6210_v24 = vld [vmem:[#allocation2 + $0x48] sm:$0xff]  ;;  %v6212_v20 = vld [vmem:[#allocation2 + $0x50] sm:$0xff]  ;;  %537 = vst.msk [vmem:[#allocation2 + $0x69] sm:$0xff] %vm504_vm2, %v500_v7  ;;  %v486_v60 = vadd.f32 %v6002_v15, %v456_v21  ;;  %v778_v55 = vpop.permute.xlu0 %777  ;;  %v794_v14 = vmul.f32 %v6042_v59, %v6208_v63  ;;  %v4110_v7 = vld [vmem:[%s7071_s5 + $0x38] sm:$0xff] }
 0x11b   :  { %3373 = vperm.xlu1 %5172, %v4323_v33   ;;  %v1664_v56 = vmul.f32 %v5719_v12, %v6210_v24  ;;  %v1665_v35 = vmul.f32 %v5717_v11, %v6212_v20  ;;  %v503_v15 = vmax.f32 %v487_v2, 0.0  ;;  %1303 = vperm.xlu0 %5171, %v4107_v16   ;;  %v795_v33 = vmul.f32 %v6064_v17, %v6194_v36  ;;  %v4324_v12 = vld [vmem:[%s7066_s9 + $0x478] sm:$0xff] }
 0x11c   :  { %v6234_v11 = vpack.c.bf16 %v4218_v38, %v4217_v1  ;;  %v6236_v59 = vld [vmem:[#allocation2 + $0x61] sm:$0xff]  ;;  %v502_v21 = vmax.f32 %v486_v60, 0.0  ;;  %4683 = vmatmul.mubr.msk.f32.gmra.mrb[24].mxu0 %vm504_vm2, %v794_v14  ;;  %v4108_v16 = vld [vmem:[%s7066_s9 + $0x178] sm:$0xff]  ;;  %v6245_v17 = vmul.f32 %v6011_v9, %v6210_v24  ;;  %v6249_v2 = vmul.f32 %v6024_v41, %v6212_v20 }
 0x11d   :  { %4772 = vmatprep.mubr.msk.f32.mxu1 %vm504_vm2, %v1664_v56  ;;  %540 = vst.msk [vmem:[#allocation2 + $0x81] sm:$0xff] %vm504_vm2, %v503_v15  ;;  %4685 = vmatprep.mubr.msk.f32.mxu0 %vm504_vm2, %v795_v33  ;;  %v6254_v60 = vpop.permute.xlu1 %2688  ;;  %v6256_v1 = vld [vmem:[#allocation2 + $0x59] sm:$0xff]  ;;  %v6262_v9 = vpack.c.bf16 %v4110_v7, %v4109_v57  ;;  %v797_v33 = vmul.f32 %v6137_v45, %v6236_v59 }
 0x11e   :  { %4773 = vmatmul.mubr.msk.f32.gmra.mrb[8].mxu1 %vm504_vm2, %v1665_v35  ;;  %v6258_v38 = vld [vmem:[#allocation2 + $0x58] sm:$0xff]  ;;  %v6260_v14 = vld [vmem:[#allocation2 + $0x60] sm:$0xff]  ;;  %539 = vst.msk [vmem:[#allocation2 + $0x79] sm:$0xff] %vm504_vm2, %v502_v21  ;;  %v783_v41 = vpop.permute.xlu0 %782  ;;  %v796_v56 = vmul.f32 %v6101_v10, %v6256_v1  ;;  %4699 = vmatpush3.msk.msra.mxu0 %vm853_vm3, %v671_v8 }
 0x11f   :  { %3378 = vperm.xlu1 %5172, %v4324_v12   ;;  %v1666_v35 = vmul.f32 %v5738_v19, %v6258_v38  ;;  %v1667_v15 = vmul.f32 %v5735_v18, %v6260_v14  ;;  %1308 = vperm.xlu0 %5171, %v4108_v16   ;;  %v6281_v19 = vmul.f32 %v6038_v34, %v6258_v38 }
 0x120   :  { %5005 = vmatprep.subr.bf16.mxu1 %v6234_v11  ;;  %v6275_v57 = vld [vmem:[#allocation2 + $0x71] sm:$0xff]  ;;  %4686 = vmatmul.mubr.msk.f32.gmra.mrb[26].mxu0 %vm504_vm2, %v796_v56  ;;  %v6285_v18 = vmul.f32 %v6054_v40, %v6260_v14  ;;  %v541_v56 = vld [vmem:[#allocation2] sm:$0xff] }
 0x121   :  { %7116 = vst [vmem:[#allocation34_spill] sm:$0xff] %v6275_v57  ;;  %4775 = vmatprep.mubr.msk.f32.mxu1 %vm504_vm2, %v1666_v35  ;;  %v6287_v10 = vld [vmem:[#allocation2 + $0x69] sm:$0xff]  ;;  %4688 = vmatprep.mubr.msk.f32.mxu0 %vm504_vm2, %v797_v33  ;;  %v6291_v45 = vpop.permute.xlu1 %2958  ;;  %v799_v16 = vmul.f32 %v778_v55, %v6275_v57 }
 0x122   :  { %7117 = vst [vmem:[#allocation35_spill] sm:$0xff] %v6287_v10  ;;  %4776 = vmatmul.mubr.msk.f32.gmra.mrb[10].mxu1 %vm504_vm2, %v1667_v15  ;;  %7118 = vst [vmem:[#allocation36_spill] sm:$0xff] %v6291_v45  ;;  %v6293_v8 = vld [vmem:[#allocation2 + $0x68] sm:$0xff]  ;;  %v6295_v7 = vld [vmem:[#allocation2 + $0x70] sm:$0xff]  ;;  %v798_v34 = vmul.f32 %v6172_v61, %v6287_v10  ;;  %v576_v12 = vpop.permute.xlu0 %575  ;;  %4993 = vmatprep.subr.bf16.mxu0 %v6262_v9 }
 0x123   :  { %v1668_v40 = vmul.f32 %v5748_v23, %v6293_v8  ;;  %v1669_v21 = vmul.f32 %v5746_v22, %v6295_v7  ;;  %v6309_v35 = vmul.f32 %v6091_v44, %v6293_v8  ;;  %v6313_v61 = vmul.f32 %v6127_v4, %v6295_v7 }
 0x124   :  { %4689 = vmatmul.mubr.msk.f32.gmra.mrb[28].mxu0 %vm504_vm2, %v798_v34 }
 0x125   :  { %4778 = vmatprep.mubr.msk.f32.mxu1 %vm504_vm2, %v1668_v40  ;;  %v2592_v23 = vld [vmem:[#allocation2 + $0x80] sm:$0xff]  ;;  %4691 = vmatprep.mubr.msk.f32.mxu0 %vm504_vm2, %v799_v16  ;;  %v6319_v22 = vpop.permute.xlu1 %2963  ;;  %v6321_v55 = vld [vmem:[#allocation2 + $0x78] sm:$0xff]  ;;  %v653_v40 = vmul.f32 %v576_v12, %v541_v56 }
 0x126   :  { %v6315_v15 = vld [vmem:[#allocation2 + $0x79] sm:$0xff]  ;;  %4779 = vmatmul.mubr.msk.f32.gmra.mrb[12].mxu1 %vm504_vm2, %v1669_v21  ;;  %v6324_v33 = vmul.f32 %v6206_v5, %v2592_v23  ;;  %v581_v34 = vpop.permute.xlu0 %580  ;;  %v1670_v4 = vmul.f32 %v5758_v27, %v6321_v55  ;;  %v1671_v45 = vmul.f32 %v2592_v23, %v5756_v26  ;;  %v2001_v21 = vmul.f32 %v5768_v32, %v6056_v49 }
 0x127   :  { %7119 = vst [vmem:[#allocation37_spill] sm:$0xff] %v6315_v15  ;;  %v800_v44 = vmul.f32 %v783_v41, %v6315_v15  ;;  %v6336_v5 = vmul.f32 %v6162_v48, %v6321_v55  ;;  %v654_v27 = vmul.f32 %v6058_v0, %v581_v34  ;;  %v2002_v32 = vmul.f32 %v5766_v30, %v6050_v25  ;;  %v4219_v48 = vld [vmem:[%s7071_s5 + $0x88] sm:$0xf]  ;;  %v4253_v0 = vld [vmem:[%s7071_s5 + $0x90] sm:$0xff] }
 0x128   :  { %4781 = vmatprep.mubr.msk.f32.mxu1 %vm504_vm2, %v1670_v4  ;;  %v2003_v49 = vmul.f32 %v5786_v39, %v6093_v54  ;;  %v4111_v39 = vld [vmem:[%s7071_s5 + $0x40] sm:$0xf]  ;;  %v2004_v23 = vmul.f32 %v5782_v37, %v6082_v62  ;;  %v2005_v34 = vmul.f32 %v5797_v43, %v6129_v52  ;;  %v2007_v43 = vmul.f32 %v5807_v47, %v6164_v51 }
 0x129   :  { %4692 = vmatmul.mubr.msk.f32.gmra.mrb[30].mxu0 %vm504_vm2, %v800_v44  ;;  %v6340_v41 = vpop.permute.xlu1 %2968 }
 0x12a   :  { %4700 = vmatprep.mubr.msk.f32.mxu0 %vm504_vm2, %v653_v40  ;;  %4782 = vmatmul.mubr.msk.f32.gmra.mrb[14].mxu1 %vm504_vm2, %v1671_v45  ;;  %v586_v26 = vpop.permute.xlu0 %585  ;;  %v4254_v45 = vld [vmem:[%s7071_s5 + $0x98] sm:$0xff] }
 0x12b   :  { %4790 = vmatprep.mubr.msk.f32.mxu1 %vm504_vm2, %v2001_v21  ;;  %v655_v12 = vmul.f32 %v6060_v28, %v586_v26  ;;  %v6372_v44 = vpack.c.bf16 %v4254_v45, %v4253_v0  ;;  %v2009_v26 = vmul.f32 %v5817_v53, %v6208_v63  ;;  %v7121_v45 = vld [vmem:[#allocation32_spill] sm:$0xff] }
 0x12d   :  { %4701 = vmatmul.mubr.msk.f32.vlgmr.msra.gmra.mrb[16].mxu0 %vm504_vm2, %v654_v27  ;;  %v6361_v30 = vpop.permute.xlu1 %2973 }
 0x12e   :  { %4703 = vmatprep.mubr.msk.f32.mxu0 %vm504_vm2, %v655_v12  ;;  %4791 = vmatmul.mubr.msk.f32.vlgmr.msra.gmra.mrb[0].mxu1 %vm504_vm2, %v2002_v32  ;;  %v591_v16 = vpop.permute.xlu0 %590 }
 0x12f   :  { %4793 = vmatprep.mubr.msk.f32.mxu1 %vm504_vm2, %v2003_v49  ;;  %5007 = vmatpush3.bf16.msra.mxu1 %v6234_v11  ;;  %v656_v56 = vmul.f32 %v6095_v31, %v591_v16  ;;  %v2010_v49 = vmul.f32 %v5815_v50, %v6194_v36  ;;  %v7122_v16 = vld [vmem:[#allocation3_spill] sm:$0xff] }
 0x130   :  { %4818 = vmatprep.subr.msk.mxu1 %vm853_vm3, %v4219_v48  ;;  %4995 = vmatpush3.bf16.msra.mxu0 %v6262_v9  ;;  %v2006_v9 = vmul.f32 %v5795_v42, %v6121_v29  ;;  %v2008_v42 = vmul.f32 %v5805_v46, %v6156_v3 }
 0x131   :  { %4728 = vmatprep.subr.msk.mxu0 %vm853_vm3, %v4111_v39  ;;  %4704 = vmatmul.mubr.msk.f32.gmra.mrb[18].mxu0 %vm504_vm2, %v656_v56  ;;  %v6380_v11 = vpop.permute.xlu1 %2978  ;;  %v2012_v56 = vmul.f32 %v7122_v16, %v6236_v59 }
 0x132   :  { %4794 = vmatmul.mubr.msk.f32.gmra.mrb[2].mxu1 %vm504_vm2, %v2004_v23  ;;  %v596_v4 = vpop.permute.xlu0 %595  ;;  %v7123_v23 = vld [vmem:[#allocation6_spill] sm:$0xff] }
 0x133   :  { %4796 = vmatprep.mubr.msk.f32.mxu1 %vm504_vm2, %v2005_v34  ;;  %4819 = vmatpush3.msk.msra.mxu1 %vm853_vm3, %v4219_v48  ;;  %v657_v37 = vmul.f32 %v6097_v58, %v596_v4  ;;  %v7120_v48 = vld [vmem:[#allocation4_spill] sm:$0xff]  ;;  %v2013_v50 = vmul.f32 %v7123_v23, %v6287_v10 }
 0x134   :  { %5009 = vmatprep.subr.bf16.mxu1 %v6372_v44  ;;  %4729 = vmatpush3.msk.msra.mxu0 %vm853_vm3, %v4111_v39  ;;  %v2011_v46 = vmul.f32 %v7120_v48, %v6256_v1 }
 0x135   :  { %4706 = vmatprep.mubr.msk.f32.mxu0 %vm504_vm2, %v657_v37  ;;  %v6393_v40 = vpop.permute.xlu1 %2983  ;;  %v7124_v37 = vld [vmem:[#allocation33_spill] sm:$0xff] }
 0x136   :  { %4797 = vmatmul.mubr.msk.f32.gmra.mrb[4].mxu1 %vm504_vm2, %v2006_v9  ;;  %v601_v21 = vpop.permute.xlu0 %600 }
 0x137   :  { %4799 = vmatprep.mubr.msk.f32.mxu1 %vm504_vm2, %v2007_v43  ;;  %v658_v27 = vmul.f32 %v6131_v6, %v601_v21  ;;  %v7125_v43 = vld [vmem:[#allocation5_spill] sm:$0xff] }
 0x138   :  { %v2014_v21 = vmul.f32 %v7125_v43, %v6275_v57 }
 0x139   :  { %4707 = vmatmul.mubr.msk.f32.gmra.mrb[20].mxu0 %vm504_vm2, %v658_v27  ;;  %v6403_v47 = vpop.permute.xlu1 %2988  ;;  %v7126_v27 = vld [vmem:[#allocation8_spill] sm:$0xff] }
 0x13a   :  { %4800 = vmatmul.mubr.msk.f32.gmra.mrb[6].mxu1 %vm504_vm2, %v2008_v42  ;;  %v606_v12 = vpop.permute.xlu0 %605  ;;  %v2015_v42 = vmul.f32 %v7126_v27, %v6315_v15  ;;  %v7132_v27 = vld [vmem:[#allocation12_spill] sm:$0xff] }
 0x13b   :  { %4802 = vmatprep.mubr.msk.f32.mxu1 %vm504_vm2, %v2009_v26  ;;  %v659_v32 = vmul.f32 %v6133_v13, %v606_v12  ;;  %v6431_v26 = vld [vmem:[#allocation2 + $0x81] sm:$0xff] }
 0x13c   :  { %7127 = vst [vmem:[#allocation4_spill] sm:$0xff] %v6431_v26 }
 0x13d   :  { %4709 = vmatprep.mubr.msk.f32.mxu0 %vm504_vm2, %v659_v32  ;;  %v6413_v53 = vpop.permute.xlu1 %2993  ;;  %v6437_v32 = vld [vmem:[#allocation2 + $0xa] sm:$0xff] }
 0x13e   :  { %4803 = vmatmul.mubr.msk.f32.gmra.mrb[8].mxu1 %vm504_vm2, %v2010_v49  ;;  %v611_v0 = vpop.permute.xlu0 %610 }
 0x13f   :  { %4805 = vmatprep.mubr.msk.f32.mxu1 %vm504_vm2, %v2011_v46  ;;  %v660_v39 = vmul.f32 %v7121_v45, %v611_v0  ;;  %v7128_v46 = vld [vmem:[#allocation7_spill] sm:$0xff] }
 0x140   :  { %v2016_v0 = vmul.f32 %v7128_v46, %v6431_v26  ;;  %v6486_v26 = vld [vmem:[#allocation2 + $0x32] sm:$0xff] }
 0x141   :  { %4710 = vmatmul.mubr.msk.f32.gmra.mrb[22].mxu0 %vm504_vm2, %v660_v39  ;;  %v6423_v34 = vpop.permute.xlu1 %2998  ;;  %v7129_v39 = vld [vmem:[#allocation10_spill] sm:$0xff] }
 0x142   :  { %4806 = vmatmul.mubr.msk.f32.gmra.mrb[10].mxu1 %vm504_vm2, %v2012_v56  ;;  %v616_v4 = vpop.permute.xlu0 %615  ;;  %v2346_v16 = vmul.f32 %v7129_v39, %v6437_v32  ;;  %v6445_v56 = vld [vmem:[#allocation2 + $0x12] sm:$0xff] }
 0x143   :  { %4808 = vmatprep.mubr.msk.f32.mxu1 %vm504_vm2, %v2013_v50  ;;  %v661_v9 = vmul.f32 %v7124_v37, %v616_v4  ;;  %v6451_v50 = vld [vmem:[#allocation2 + $0x1a] sm:$0xff] }
 0x145   :  { %4712 = vmatprep.mubr.msk.f32.mxu0 %vm504_vm2, %v661_v9  ;;  %v6435_v12 = vpop.permute.xlu1 %3003  ;;  %v7131_v9 = vld [vmem:[#allocation9_spill] sm:$0xff] }
 0x146   :  { %4809 = vmatmul.mubr.msk.f32.gmra.mrb[12].mxu1 %vm504_vm2, %v2014_v21  ;;  %v621_v49 = vpop.permute.xlu0 %620  ;;  %v2347_v43 = vmul.f32 %v7131_v9, %v6445_v56  ;;  %v4255_v21 = vld [vmem:[%s7071_s5 + $0xa0] sm:$0xf] }
 0x147   :  { %4811 = vmatprep.mubr.msk.f32.mxu1 %vm504_vm2, %v2015_v42  ;;  %v662_v48 = vmul.f32 %v6210_v24, %v621_v49  ;;  %v2348_v42 = vmul.f32 %v7132_v27, %v6451_v50  ;;  %v6462_v49 = vld [vmem:[#allocation2 + $0x22] sm:$0xff] }
 0x149   :  { %4713 = vmatmul.mubr.msk.f32.gmra.mrb[24].mxu0 %vm504_vm2, %v662_v48  ;;  %v6449_v23 = vpop.permute.xlu1 %3008  ;;  %v4289_v48 = vld [vmem:[%s7071_s5 + $0xa8] sm:$0xff] }
 0x14a   :  { %4812 = vmatmul.mubr.msk.f32.gmra.mrb[14].mxu1 %vm504_vm2, %v2016_v0  ;;  %7130 = vst [vmem:[#allocation32_spill] sm:$0xff] %v6449_v23  ;;  %v626_v4 = vpop.permute.xlu0 %625  ;;  %v6474_v0 = vld [vmem:[#allocation2 + $0x2a] sm:$0xff]  ;;  %v6555_v23 = vld [vmem:[#allocation2 + $0x82] sm:$0xff] }
 0x14b   :  { %4820 = vmatprep.mubr.msk.f32.mxu1 %vm504_vm2, %v2346_v16  ;;  %v663_v24 = vmul.f32 %v6212_v20, %v626_v4  ;;  %v4290_v20 = vld [vmem:[%s7071_s5 + $0xb0] sm:$0xff]  ;;  %v7134_v4 = vld [vmem:[#allocation11_spill] sm:$0xff] }
 0x14c   :  { %v2349_v9 = vmul.f32 %v7134_v4, %v6462_v49  ;;  %v6482_v27 = vpack.c.bf16 %v4290_v20, %v4289_v48  ;;  %v7137_v20 = vld [vmem:[#allocation13_spill] sm:$0xff] }
 0x14d   :  { %4715 = vmatprep.mubr.msk.f32.mxu0 %vm504_vm2, %v663_v24  ;;  %v6472_v46 = vpop.permute.xlu1 %3013  ;;  %v7135_v24 = vld [vmem:[#allocation14_spill] sm:$0xff] }
 0x14e   :  { %4821 = vmatmul.mubr.msk.f32.vlgmr.msra.gmra.mrb[0].mxu1 %vm504_vm2, %v2347_v43  ;;  %7133 = vst [vmem:[#allocation3_spill] sm:$0xff] %v6472_v46  ;;  %v631_v39 = vpop.permute.xlu0 %630  ;;  %v2350_v43 = vmul.f32 %v7135_v24, %v6474_v0  ;;  %v6506_v24 = vld [vmem:[#allocation2 + $0x4a] sm:$0xff]  ;;  %v6542_v46 = vld [vmem:[#allocation2 + $0x72] sm:$0xff] }
 0x14f   :  { %4823 = vmatprep.mubr.msk.f32.mxu1 %vm504_vm2, %v2348_v42  ;;  %5011 = vmatpush3.bf16.msra.mxu1 %v6372_v44  ;;  %v664_v16 = vmul.f32 %v6258_v38, %v631_v39  ;;  %v6490_v42 = vld [vmem:[#allocation2 + $0x3a] sm:$0xff]  ;;  %v2351_v39 = vmul.f32 %v7137_v20, %v6486_v26 }
 0x150   :  { %4848 = vmatprep.subr.msk.mxu1 %vm853_vm3, %v4255_v21 }
 0x151   :  { %4716 = vmatmul.mubr.msk.f32.gmra.mrb[26].mxu0 %vm504_vm2, %v664_v16  ;;  %v6492_v44 = vpop.permute.xlu1 %3018  ;;  %v7138_v16 = vld [vmem:[#allocation16_spill] sm:$0xff] }
 0x152   :  { %4824 = vmatmul.mubr.msk.f32.gmra.mrb[2].mxu1 %vm504_vm2, %v2349_v9  ;;  %7136 = vst [vmem:[#allocation6_spill] sm:$0xff] %v6492_v44  ;;  %v636_v38 = vpop.permute.xlu0 %635  ;;  %v2352_v4 = vmul.f32 %v7138_v16, %v6490_v42  ;;  %v6502_v9 = vld [vmem:[#allocation2 + $0x42] sm:$0xff]  ;;  %v7141_v16 = vld [vmem:[#allocation18_spill] sm:$0xff] }
 0x153   :  { %4826 = vmatprep.mubr.msk.f32.mxu1 %vm504_vm2, %v2350_v43  ;;  %4849 = vmatpush3.msk.msra.mxu1 %vm853_vm3, %v4255_v21  ;;  %v665_v48 = vmul.f32 %v6260_v14, %v636_v38  ;;  %v7139_v21 = vld [vmem:[#allocation15_spill] sm:$0xff]  ;;  %v2354_v15 = vmul.f32 %v7141_v16, %v6506_v24  ;;  %v6528_v16 = vld [vmem:[#allocation2 + $0x62] sm:$0xff] }
 0x154   :  { %5013 = vmatprep.subr.bf16.mxu1 %v6482_v27  ;;  %v2353_v38 = vmul.f32 %v7139_v21, %v6502_v9  ;;  %v6516_v44 = vld [vmem:[#allocation2 + $0x52] sm:$0xff]  ;;  %v7143_v21 = vld [vmem:[#allocation20_spill] sm:$0xff] }
 0x155   :  { %4718 = vmatprep.mubr.msk.f32.mxu0 %vm504_vm2, %v665_v48  ;;  %v6512_v20 = vpop.permute.xlu1 %3023  ;;  %v6520_v48 = vld [vmem:[#allocation2 + $0x5a] sm:$0xff] }
 0x156   :  { %4827 = vmatmul.mubr.msk.f32.gmra.mrb[4].mxu1 %vm504_vm2, %v2351_v39  ;;  %v641_v43 = vpop.permute.xlu0 %640  ;;  %7140 = vst [vmem:[#allocation33_spill] sm:$0xff] %v6512_v20  ;;  %v2356_v20 = vmul.f32 %v7143_v21, %v6520_v48 }
 0x157   :  { %4829 = vmatprep.mubr.msk.f32.mxu1 %vm504_vm2, %v2352_v4  ;;  %v666_v14 = vmul.f32 %v6293_v8, %v641_v43  ;;  %v7142_v4 = vld [vmem:[#allocation17_spill] sm:$0xff] }
 0x158   :  { %v2355_v43 = vmul.f32 %v7142_v4, %v6516_v44  ;;  %v7146_v4 = vld [vmem:[#allocation22_spill] sm:$0xff] }
 0x159   :  { %4719 = vmatmul.mubr.msk.f32.gmra.mrb[28].mxu0 %vm504_vm2, %v666_v14  ;;  %v6532_v14 = vld [vmem:[#allocation2 + $0x6a] sm:$0xff] }
 0x15a   :  { %4830 = vmatmul.mubr.msk.f32.gmra.mrb[6].mxu1 %vm504_vm2, %v2353_v38  ;;  %v646_v39 = vpop.permute.xlu0 %645  ;;  %v6534_v38 = vpop.permute.xlu1 %3028  ;;  %v2358_v21 = vmul.f32 %v7146_v4, %v6532_v14  ;;  %v7148_v4 = vld [vmem:[#allocation24_spill] sm:$0xff] }
 0x15b   :  { %4832 = vmatprep.mubr.msk.f32.mxu1 %vm504_vm2, %v2354_v15  ;;  %v667_v8 = vmul.f32 %v6295_v7, %v646_v39  ;;  %7144 = vst [vmem:[#allocation5_spill] sm:$0xff] %v6534_v38  ;;  %v7145_v15 = vld [vmem:[#allocation19_spill] sm:$0xff]  ;;  %v1198_v38 = vld [vmem:[#allocation2 + $0x2] sm:$0xff] }
 0x15c   :  { %v2357_v39 = vmul.f32 %v7145_v15, %v6528_v16 }
 0x15d   :  { %4721 = vmatprep.mubr.msk.f32.mxu0 %vm504_vm2, %v667_v8  ;;  %v6546_v8 = vld [vmem:[#allocation2 + $0x7a] sm:$0xff] }
 0x15e   :  { %4833 = vmatmul.mubr.msk.f32.gmra.mrb[8].mxu1 %vm504_vm2, %v2355_v43  ;;  %v651_v57 = vpop.permute.xlu0 %650  ;;  %v6551_v15 = vpop.permute.xlu1 %3033  ;;  %v2360_v10 = vmul.f32 %v7148_v4, %v6546_v8 }
 0x15f   :  { %4835 = vmatprep.mubr.msk.f32.mxu1 %vm504_vm2, %v2356_v20  ;;  %v668_v7 = vmul.f32 %v6321_v55, %v651_v57  ;;  %v7147_v57 = vld [vmem:[#allocation21_spill] sm:$0xff] }
 0x160   :  { %v2359_v55 = vmul.f32 %v7147_v57, %v6542_v46 }
 0x161   :  { %4722 = vmatmul.mubr.msk.f32.gmra.mrb[30].mxu0 %vm504_vm2, %v668_v7 }
 0x162   :  { %4836 = vmatmul.mubr.msk.f32.gmra.mrb[10].mxu1 %vm504_vm2, %v2357_v39  ;;  %v1234_v43 = vpop.permute.xlu0 %1233  ;;  %v6567_v4 = vpop.permute.xlu1 %3303 }
 0x163   :  { %4838 = vmatprep.mubr.msk.f32.mxu1 %vm504_vm2, %v2358_v21  ;;  %v1311_v20 = vmul.f32 %v1234_v43, %v1198_v38  ;;  %v7149_v38 = vld [vmem:[#allocation23_spill] sm:$0xff]  ;;  %v7150_v43 = vld [vmem:[#allocation25_spill] sm:$0xff] }
 0x164   :  { %v2361_v21 = vmul.f32 %v7149_v38, %v6555_v23  ;;  %v2691_v57 = vmul.f32 %v7150_v43, %v6060_v28  ;;  %v4291_v28 = vld [vmem:[%s7071_s5 + $0xb8] sm:$0xf]  ;;  %v7153_v43 = vld [vmem:[#allocation28_spill] sm:$0xff] }
 0x165   :  { %4730 = vmatprep.mubr.msk.f32.mxu0 %vm504_vm2, %v1311_v20 }
 0x166   :  { %4839 = vmatmul.mubr.msk.f32.gmra.mrb[12].mxu1 %vm504_vm2, %v2359_v55  ;;  %v1239_v7 = vpop.permute.xlu0 %1238 }
 0x167   :  { %4841 = vmatprep.mubr.msk.f32.mxu1 %vm504_vm2, %v2360_v10  ;;  %v1312_v39 = vmul.f32 %v6437_v32, %v1239_v7  ;;  %v7151_v10 = vld [vmem:[#allocation26_spill] sm:$0xff]  ;;  %v7152_v7 = vld [vmem:[#allocation27_spill] sm:$0xff] }
 0x168   :  { %v2692_v32 = vmul.f32 %v7151_v10, %v6095_v31  ;;  %v2693_v38 = vmul.f32 %v7152_v7, %v6097_v58  ;;  %v6592_v10 = vpop.permute.xlu1 %3308  ;;  %v7154_v7 = vld [vmem:[#allocation29_spill] sm:$0xff] }
 0x169   :  { %4731 = vmatmul.mubr.msk.f32.vlgmr.msra.gmra.mrb[16].mxu0 %vm504_vm2, %v1312_v39  ;;  %v4325_v39 = vld [vmem:[%s7071_s5 + $0xc0] sm:$0xff] }
 0x16a   :  { %4842 = vmatmul.mubr.msk.f32.gmra.mrb[14].mxu1 %vm504_vm2, %v2361_v21  ;;  %v1244_v20 = vpop.permute.xlu0 %1243  ;;  %v4326_v21 = vld [vmem:[%s7071_s5 + $0xc8] sm:$0xff] }
 0x16b   :  { %4850 = vmatprep.mubr.msk.f32.mxu1 %vm504_vm2, %v2691_v57  ;;  %v1313_v55 = vmul.f32 %v6445_v56, %v1244_v20  ;;  %v2694_v57 = vmul.f32 %v7153_v43, %v6131_v6  ;;  %v5016_v20 = vpack.c.bf16 %v4326_v21, %v4325_v39  ;;  %v7155_v6 = vld [vmem:[#allocation30_spill] sm:$0xff]  ;;  %v7156_v39 = vld [vmem:[#allocation31_spill] sm:$0xff] }
 0x16c   :  { %v2697_v21 = vmul.f32 %v7156_v39, %v7124_v37 }
 0x16d   :  { %4733 = vmatprep.mubr.msk.f32.mxu0 %vm504_vm2, %v1313_v55  ;;  %v2695_v55 = vmul.f32 %v7154_v7, %v6133_v13  ;;  %v6607_v13 = vpop.permute.xlu1 %3313 }
 0x16e   :  { %4851 = vmatmul.mubr.msk.f32.vlgmr.msra.gmra.mrb[0].mxu1 %vm504_vm2, %v2692_v32  ;;  %v1249_v31 = vpop.permute.xlu0 %1248 }
 0x16f   :  { %4853 = vmatprep.mubr.msk.f32.mxu1 %vm504_vm2, %v2693_v38  ;;  %5015 = vmatpush3.bf16.msra.mxu1 %v6482_v27  ;;  %v1314_v58 = vmul.f32 %v6451_v50, %v1249_v31  ;;  %v2696_v38 = vmul.f32 %v7155_v6, %v7121_v45 }
 0x170   :  { %4878 = vmatprep.subr.msk.mxu1 %vm853_vm3, %v4291_v28 }
 0x171   :  { %4734 = vmatmul.mubr.msk.f32.gmra.mrb[18].mxu0 %vm504_vm2, %v1314_v58  ;;  %v6617_v58 = vpop.permute.xlu1 %3318 }
 0x172   :  { %4854 = vmatmul.mubr.msk.f32.gmra.mrb[2].mxu1 %vm504_vm2, %v2694_v57  ;;  %v1254_v32 = vpop.permute.xlu0 %1253 }
 0x173   :  { %4856 = vmatprep.mubr.msk.f32.mxu1 %vm504_vm2, %v2695_v55  ;;  %4879 = vmatpush3.msk.msra.mxu1 %vm853_vm3, %v4291_v28  ;;  %v1315_v27 = vmul.f32 %v6462_v49, %v1254_v32  ;;  %v7157_v32 = vld [vmem:[#allocation36_spill] sm:$0xff] }
 0x174   :  { %5017 = vmatprep.subr.bf16.mxu1 %v5016_v20 }
 0x175   :  { %4736 = vmatprep.mubr.msk.f32.mxu0 %vm504_vm2, %v1315_v27  ;;  %v3036_v27 = vmul.f32 %v7157_v32, %v6050_v25  ;;  %v4327_v25 = vld [vmem:[%s7071_s5 + $0xd0] sm:$0xf] }
 0x176   :  { %4857 = vmatmul.mubr.msk.f32.gmra.mrb[4].mxu1 %vm504_vm2, %v2696_v38  ;;  %v1259_v31 = vpop.permute.xlu0 %1258  ;;  %v2938_v32 = vld [vmem:[#allocation2 + $0x89] sm:$0xff] }
 0x177   :  { %4859 = vmatprep.mubr.msk.f32.mxu1 %vm504_vm2, %v2697_v21  ;;  %v1316_v28 = vmul.f32 %v6474_v0, %v1259_v31 }
 0x179   :  { %4737 = vmatmul.mubr.msk.f32.gmra.mrb[20].mxu0 %vm504_vm2, %v1316_v28 }
 0x17a   :  { %4860 = vmatmul.mubr.msk.f32.gmra.mrb[6].mxu1 %vm504_vm2, %v6245_v17  ;;  %v1264_v45 = vpop.permute.xlu0 %1263  ;;  %v6628_v17 = vpop.permute.xlu1 %3323 }
 0x17b   :  { %4862 = vmatprep.mubr.msk.f32.mxu1 %vm504_vm2, %v6249_v2  ;;  %v1317_v37 = vmul.f32 %v6486_v26, %v1264_v45  ;;  %v7160_v45 = vld [vmem:[#allocation3_spill] sm:$0xff] }
 0x17d   :  { %4739 = vmatprep.mubr.msk.f32.mxu0 %vm504_vm2, %v1317_v37 }
 0x17e   :  { %4863 = vmatmul.mubr.msk.f32.gmra.mrb[8].mxu1 %vm504_vm2, %v6281_v19  ;;  %v1269_v43 = vpop.permute.xlu0 %1268  ;;  %v2593_v19 = vld [vmem:[#allocation2 + $0x88] sm:$0xff] }
 0x17f   :  { %4865 = vmatprep.mubr.msk.f32.mxu1 %vm504_vm2, %v6285_v18  ;;  %v1318_v57 = vmul.f32 %v6490_v42, %v1269_v43 }
 0x181   :  { %4740 = vmatmul.mubr.msk.f32.gmra.mrb[22].mxu0 %vm504_vm2, %v1318_v57  ;;  %v7161_v57 = vld [vmem:[#allocation34_spill] sm:$0xff] }
 0x182   :  { %4866 = vmatmul.mubr.msk.f32.gmra.mrb[10].mxu1 %vm504_vm2, %v6309_v35  ;;  %v1274_v2 = vpop.permute.xlu0 %1273  ;;  %v2706_v35 = vmul.f32 %v6254_v60, %v2593_v19  ;;  %v3038_v60 = vmul.f32 %v6340_v41, %v6082_v62  ;;  %v3040_v62 = vmul.f32 %v6380_v11, %v6121_v29  ;;  %v3043_v11 = vmul.f32 %v6413_v53, %v6208_v63  ;;  %v7158_v63 = vld [vmem:[#allocation32_spill] sm:$0xff] }
 0x183   :  { %4868 = vmatprep.mubr.msk.f32.mxu1 %vm504_vm2, %v6313_v61  ;;  %v1319_v7 = vmul.f32 %v6502_v9, %v1274_v2  ;;  %v6642_v61 = vpop.permute.xlu1 %3328  ;;  %v3046_v53 = vmul.f32 %v7158_v63, %v6236_v59  ;;  %v7162_v2 = vld [vmem:[#allocation6_spill] sm:$0xff]  ;;  %v7163_v59 = vld [vmem:[#allocation37_spill] sm:$0xff] }
 0x185   :  { %4742 = vmatprep.mubr.msk.f32.mxu0 %vm504_vm2, %v1319_v7  ;;  %v7164_v7 = vld [vmem:[#allocation33_spill] sm:$0xff] }
 0x186   :  { %4869 = vmatmul.mubr.msk.f32.gmra.mrb[12].mxu1 %vm504_vm2, %v6336_v5  ;;  %v1279_v18 = vpop.permute.xlu0 %1278  ;;  %v3037_v5 = vmul.f32 %v6319_v22, %v6093_v54  ;;  %v3039_v54 = vmul.f32 %v6361_v30, %v6129_v52  ;;  %v3042_v30 = vmul.f32 %v6403_v47, %v6156_v3  ;;  %v3045_v47 = vmul.f32 %v6435_v12, %v6256_v1 }
 0x187   :  { %4871 = vmatprep.mubr.msk.f32.mxu1 %vm504_vm2, %v6324_v33  ;;  %v1320_v55 = vmul.f32 %v6506_v24, %v1279_v18  ;;  %v6657_v38 = vpop.permute.xlu1 %3333  ;;  %v3048_v1 = vmul.f32 %v7162_v2, %v7161_v57  ;;  %v3049_v19 = vmul.f32 %v7164_v7, %v7163_v59  ;;  %v7165_v18 = vld [vmem:[#allocation4_spill] sm:$0xff] }
 0x189   :  { %4743 = vmatmul.mubr.msk.f32.gmra.mrb[24].mxu0 %vm504_vm2, %v1320_v55 }
 0x18a   :  { %4872 = vmatmul.mubr.msk.f32.gmra.mrb[14].mxu1 %vm504_vm2, %v2706_v35  ;;  %v1284_v6 = vpop.permute.xlu0 %1283  ;;  %v7166_v35 = vld [vmem:[#allocation5_spill] sm:$0xff] }
 0x18b   :  { %4880 = vmatprep.mubr.msk.f32.mxu1 %vm504_vm2, %v3036_v27  ;;  %v1321_v33 = vmul.f32 %v6516_v44, %v1284_v6  ;;  %v3339_v21 = vpop.permute.xlu1 %3338  ;;  %v3050_v55 = vmul.f32 %v7166_v35, %v7165_v18  ;;  %v3051_v6 = vmul.f32 %v6551_v15, %v2938_v32  ;;  %v3384_v15 = vmul.f32 %v6617_v58, %v6474_v0  ;;  %v6832_v35 = vld [vmem:[%s7074_s6] ss:$0 sm:$0xff] }
 0x18c   :  { %v3388_v0 = vmul.f32 %v3339_v21, %v6506_v24  ;;  %v5182_v21 = vld [vmem:[%s7068_s1 + $0x40] sm:$0xff] }
 0x18d   :  { %4745 = vmatprep.mubr.msk.f32.mxu0 %vm504_vm2, %v1321_v33  ;;  %v3382_v33 = vmul.f32 %v6592_v10, %v6451_v50  ;;  %v3386_v50 = vmul.f32 %v6642_v61, %v6490_v42 }
 0x18e   :  { %4881 = vmatmul.mubr.msk.f32.vlgmr.msra.gmra.mrb[0].mxu1 %vm504_vm2, %v3037_v5  ;;  %v1289_v39 = vpop.permute.xlu0 %1288  ;;  %v3381_v5 = vmul.f32 %v6567_v4, %v6445_v56  ;;  %v3385_v56 = vmul.f32 %v6628_v17, %v6486_v26 }
 0x18f   :  { %4883 = vmatprep.mubr.msk.f32.mxu1 %vm504_vm2, %v3038_v60  ;;  %5019 = vmatpush3.bf16.msra.mxu1 %v5016_v20  ;;  %v1322_v22 = vmul.f32 %v6520_v48, %v1289_v39  ;;  %v3041_v20 = vmul.f32 %v6393_v40, %v6164_v51  ;;  %v3044_v51 = vmul.f32 %v6423_v34, %v6194_v36  ;;  %v3344_v3 = vpop.permute.xlu1 %3343  ;;  %v7159_v34 = vld [vmem:[#allocation35_spill] sm:$0xff]  ;;  %v5174_v39 = vld [vmem:[%s7068_s1] sm:$0xff] }
 0x190   :  { %4908 = vmatprep.subr.msk.mxu1 %vm853_vm3, %v4327_v25  ;;  %v3047_v37 = vmul.f32 %v7160_v45, %v7159_v34  ;;  %v3383_v60 = vmul.f32 %v6607_v13, %v6462_v49  ;;  %v3387_v49 = vmul.f32 %v6657_v38, %v6502_v9  ;;  %v3389_v10 = vmul.f32 %v3344_v3, %v6516_v44  ;;  %v5173_v38 = vld [vmem:[%s7068_s1 + $0x8] sm:$0xff] }
 0x191   :  { %4746 = vmatmul.mubr.msk.f32.gmra.mrb[26].mxu0 %vm504_vm2, %v1322_v22  ;;  %3908 = vrot.lane.b32.xlu1 %v5173_v38, %s5207_s25  ;;  %v5176_v22 = vld [vmem:[%s7068_s1 + $0x10] sm:$0xff]  ;;  %v5185_v3 = vld [vmem:[%s7068_s1 + $0x68] sm:$0xff] }
 0x192   :  { %4884 = vmatmul.mubr.msk.f32.gmra.mrb[2].mxu1 %vm504_vm2, %v3039_v54  ;;  %v1294_v41 = vpop.permute.xlu0 %1293  ;;  %3906 = vrot.lane.b32.xlu0 %v5174_v39, %s5207_s25  ;;  %v5175_v54 = vld [vmem:[%s7068_s1 + $0x18] sm:$0xff] }
 0x193   :  { %4886 = vmatprep.mubr.msk.f32.mxu1 %vm504_vm2, %v3040_v62  ;;  %4909 = vmatpush3.msk.msra.mxu1 %vm853_vm3, %v4327_v25  ;;  %v1323_v52 = vmul.f32 %v6528_v16, %v1294_v41  ;;  %v3349_v12 = vpop.permute.xlu1 %3348  ;;  %v5177_v62 = vld [vmem:[%s7068_s1 + $0x28] sm:$0xff]  ;;  %v5178_v41 = vld [vmem:[%s7068_s1 + $0x20] sm:$0xff] }
 0x194   :  { %v3390_v13 = vmul.f32 %v3349_v12, %v6520_v48  ;;  %v3283_v48 = vld [vmem:[#allocation2 + $0x8a] sm:$0xff] }
 0x195   :  { %4748 = vmatprep.mubr.msk.f32.mxu0 %vm504_vm2, %v1323_v52  ;;  %3912 = vrot.lane.b32.xlu1 %v5175_v54, %s5207_s25  ;;  %v5180_v52 = vld [vmem:[%s7068_s1 + $0x30] sm:$0xff] }
 0x196   :  { %4887 = vmatmul.mubr.msk.f32.gmra.mrb[4].mxu1 %vm504_vm2, %v3041_v20  ;;  %v1299_v29 = vpop.permute.xlu0 %1298  ;;  %3910 = vrot.lane.b32.xlu0 %v5176_v22, %s5207_s25  ;;  %v5179_v20 = vld [vmem:[%s7068_s1 + $0x38] sm:$0xff] }
 0x197   :  { %4889 = vmatprep.mubr.msk.f32.mxu1 %vm504_vm2, %v3042_v30  ;;  %v1324_v31 = vmul.f32 %v6532_v14, %v1299_v29  ;;  %v3354_v27 = vpop.permute.xlu1 %3353  ;;  %v5181_v30 = vld [vmem:[%s7068_s1 + $0x48] sm:$0xff]  ;;  %v5183_v29 = vld [vmem:[%s7068_s1 + $0x58] sm:$0xff] }
 0x198   :  { %v3391_v42 = vmul.f32 %v3354_v27, %v6528_v16 }
 0x199   :  { %4749 = vmatmul.mubr.msk.f32.gmra.mrb[28].mxu0 %vm504_vm2, %v1324_v31  ;;  %3916 = vrot.lane.b32.xlu1 %v5177_v62, %s5207_s25 }
 0x19a   :  { %4890 = vmatmul.mubr.msk.f32.gmra.mrb[6].mxu1 %vm504_vm2, %v3043_v11  ;;  %v1304_v40 = vpop.permute.xlu0 %1303  ;;  %3914 = vrot.lane.b32.xlu0 %v5178_v41, %s5207_s25  ;;  %v5184_v11 = vld [vmem:[%s7068_s1 + $0x50] sm:$0xff] }
 0x19b   :  { %4892 = vmatprep.mubr.msk.f32.mxu1 %vm504_vm2, %v3044_v51  ;;  %v1325_v28 = vmul.f32 %v6542_v46, %v1304_v40  ;;  %v3359_v25 = vpop.permute.xlu1 %3358  ;;  %v5186_v40 = vld [vmem:[%s7068_s1 + $0x60] sm:$0xff] }
 0x19c   :  { %v3392_v58 = vmul.f32 %v3359_v25, %v6532_v14  ;;  %v3653_v14 = vld [vmem:[%s7073_s7 + $0x8] sm:$0xff] }
 0x19d   :  { %4751 = vmatprep.mubr.msk.f32.mxu0 %vm504_vm2, %v1325_v28  ;;  %3920 = vrot.lane.b32.xlu1 %v5179_v20, %s5207_s25  ;;  %v5188_v28 = vld [vmem:[%s7068_s1 + $0x70] sm:$0xff] }
 0x19e   :  { %4893 = vmatmul.mubr.msk.f32.gmra.mrb[8].mxu1 %vm504_vm2, %v3045_v47  ;;  %v1309_v36 = vpop.permute.xlu0 %1308  ;;  %3918 = vrot.lane.b32.xlu0 %v5180_v52, %s5207_s25  ;;  %v5187_v47 = vld [vmem:[%s7068_s1 + $0x78] sm:$0xff] }
 0x19f   :  { %4895 = vmatprep.mubr.msk.f32.mxu1 %vm504_vm2, %v3046_v53  ;;  %v1326_v43 = vmul.f32 %v6546_v8, %v1309_v36  ;;  %v3364_v4 = vpop.permute.xlu1 %3363 }
 0x1a0   :  { %v3393_v24 = vmul.f32 %v3364_v4, %v6542_v46  ;;  %v3652_v46 = vld [vmem:[%s7073_s7] sm:$0xff] }
 0x1a1   :  { %4752 = vmatmul.mubr.msk.f32.gmra.mrb[30].mxu0 %vm504_vm2, %v1326_v43  ;;  %3924 = vrot.lane.b32.xlu1 %v5181_v30, %s5207_s25 }
 0x1a2   :  { %4896 = vmatmul.mubr.msk.f32.gmra.mrb[10].mxu1 %vm504_vm2, %v3047_v37  ;;  %3922 = vrot.lane.b32.xlu0 %v5182_v21, %s5207_s25 }
 0x1a3   :  { %4898 = vmatprep.mubr.msk.f32.mxu1 %vm504_vm2, %v3048_v1  ;;  %v3369_v26 = vpop.permute.xlu1 %3368 }
 0x1a4   :  { %v3394_v44 = vmul.f32 %v3369_v26, %v6546_v8  ;;  %v5020_v8 = vpack.c.bf16 %v3653_v14, %v3652_v46 }
 0x1a5   :  { %3928 = vrot.lane.b32.xlu1 %v5183_v29, %s5207_s25 }
 0x1a6   :  { %4899 = vmatmul.mubr.msk.f32.gmra.mrb[12].mxu1 %vm504_vm2, %v3049_v19  ;;  %5021 = vmatprep.subr.bf16.mxu0 %v5020_v8 }
 0x1a7   :  { %4901 = vmatprep.mubr.msk.f32.mxu1 %vm504_vm2, %v3050_v55  ;;  %v3374_v9 = vpop.permute.xlu1 %3373  ;;  %5023 = vmatpush3.bf16.msra.mxu0 %v5020_v8 }
 0x1a8   :  { %v3395_v17 = vmul.f32 %v3374_v9, %v6555_v23  ;;  %v3654_v23 = vld [vmem:[%s7073_s7 + $0x10] sm:$0xf]  ;;  %3926 = vrot.lane.b32.xlu0 %v5184_v11, %s5207_s25 }
 0x1a9   :  { %4938 = vmatprep.subr.msk.mxu0 %vm853_vm3, %v3654_v23  ;;  %3932 = vrot.lane.b32.xlu1 %v5185_v3, %s5207_s25 }
 0x1aa   :  { %4902 = vmatmul.mubr.msk.f32.gmra.mrb[14].mxu1 %vm504_vm2, %v3051_v6 }
 0x1ab   :  { %4910 = vmatprep.mubr.msk.f32.mxu1 %vm504_vm2, %v3381_v5  ;;  %v3379_v61 = vpop.permute.xlu1 %3378  ;;  %4939 = vmatpush3.msk.msra.mxu0 %vm853_vm3, %v3654_v23 }
 0x1ac   :  { %v3396_v16 = vmul.f32 %v3379_v61, %v3283_v48  ;;  %3930 = vrot.lane.b32.xlu0 %v5186_v40, %s5207_s25 }
 0x1ad   :  { %3936 = vrot.lane.b32.xlu1 %v5187_v47, %s5207_s25 }
 0x1ae   :  { %4911 = vmatmul.mubr.msk.f32.vlgmr.msra.gmra.mrb[0].mxu1 %vm504_vm2, %v3382_v33 }
 0x1af   :  { %4913 = vmatprep.mubr.msk.f32.mxu1 %vm504_vm2, %v3383_v60 }
 0x1b0   :  { %3934 = vrot.lane.b32.xlu0 %v5188_v28, %s5207_s25 }
 0x1b2   :  { %4914 = vmatmul.mubr.msk.f32.gmra.mrb[2].mxu1 %vm504_vm2, %v3384_v15 }
 0x1b3   :  { %4916 = vmatprep.mubr.msk.f32.mxu1 %vm504_vm2, %v3385_v56 }
 0x1b6   :  { %4917 = vmatmul.mubr.msk.f32.gmra.mrb[4].mxu1 %vm504_vm2, %v3386_v50 }
 0x1b7   :  { %4919 = vmatprep.mubr.msk.f32.mxu1 %vm504_vm2, %v3387_v49 }
 0x1ba   :  { %4920 = vmatmul.mubr.msk.f32.gmra.mrb[6].mxu1 %vm504_vm2, %v3388_v0 }
 0x1bb   :  { %4922 = vmatprep.mubr.msk.f32.mxu1 %vm504_vm2, %v3389_v10 }
 0x1be   :  { %4923 = vmatmul.mubr.msk.f32.gmra.mrb[8].mxu1 %vm504_vm2, %v3390_v13 }
 0x1bf   :  { %4925 = vmatprep.mubr.msk.f32.mxu1 %vm504_vm2, %v3391_v42 }
 0x1c2   :  { %4926 = vmatmul.mubr.msk.f32.gmra.mrb[10].mxu1 %vm504_vm2, %v3392_v58 }
 0x1c3   :  { %4928 = vmatprep.mubr.msk.f32.mxu1 %vm504_vm2, %v3393_v24 }
 0x1c6   :  { %4929 = vmatmul.mubr.msk.f32.gmra.mrb[12].mxu1 %vm504_vm2, %v3394_v44 }
 0x1c7   :  { %4931 = vmatprep.mubr.msk.f32.mxu1 %vm504_vm2, %v3395_v17 }
 0x1ca   :  { %4932 = vmatmul.mubr.msk.f32.gmra.mrb[14].mxu1 %vm504_vm2, %v3396_v16 }
 0x23c   :  { %v4732_v31 = vpop.f32.mrb[16].mxu0 }
 0x23d   :  { %v1448_v51 = vpop.f32.mrb[17].mxu0 }
 0x244   :  { %v4735_v63 = vpop.f32.mrb[18].mxu0 }
 0x245   :  { %v1458_v53 = vpop.f32.mrb[19].mxu0 }
 0x24c   :  { %v4738_v36 = vpop.f32.mrb[20].mxu0 }
 0x24d   :  { %v1468_v34 = vpop.f32.mrb[21].mxu0 }
 0x254   :  { %v4741_v45 = vpop.f32.mrb[22].mxu0 }
 0x255   :  { %v1478_v37 = vpop.f32.mrb[23].mxu0 }
 0x25c   :  { %v4744_v43 = vpop.f32.mrb[24].mxu0 }
 0x25d   :  { %v1488_v57 = vpop.f32.mrb[25].mxu0 }
 0x264   :  { %v4747_v2 = vpop.f32.mrb[26].mxu0 }
 0x265   :  { %v1498_v1 = vpop.f32.mrb[27].mxu0 }
 0x26c   :  { %v4750_v12 = vpop.f32.mrb[28].mxu0 }
 0x26d   :  { %v6823_v59 = vpop.f32.mrb[29].mxu0 }
 0x274   :  { %v6825_v7 = vpop.f32.mrb[30].mxu0 }
 0x275   :  { %v6827_v19 = vpop.f32.mrb[31].mxu0 }
 0x281   :  { %v4912_v18 = vpop.f32.mrb[0].mxu1 }
 0x282   :  { %v5024_v55 = vadd.f32 %v4912_v18, %v4732_v31  ;;  %v3518_v32 = vpop.f32.mrb[1].mxu1 }
 0x283   :  { %v5025_v27 = vadd.f32 %v3518_v32, %v1448_v51 }
 0x284   :  { %v3621_v6 = vadd.f32 %v5024_v55, %v6832_v35 }
 0x285   :  { %v3620_v5 = vadd.f32 %v5025_v27, %v6832_v35  ;;  %v4915_v33 = vpop.f32.mrb[2].mxu1  ;;  %v3907_v27 = vpop.permute.xlu0 %3906 }
 0x286   :  { %v5026_v60 = vadd.f32 %v4915_v33, %v4735_v63  ;;  %v3528_v25 = vpop.f32.mrb[3].mxu1  ;;  %v3637_v4 = vmax.f32 %v3621_v6, 0.0 }
 0x287   :  { %v3636_v15 = vmax.f32 %v3620_v5, 0.0  ;;  %v5027_v56 = vadd.f32 %v3528_v25, %v1458_v53 }
 0x288   :  { %v3623_v50 = vadd.f32 %v5026_v60, %v6832_v35 }
 0x289   :  { %v3622_v49 = vadd.f32 %v5027_v56, %v6832_v35  ;;  %v4918_v0 = vpop.f32.mrb[4].mxu1  ;;  %4940 = vmatprep.mubr.msk.f32.mxu0 %vm504_vm2, %v3636_v15  ;;  %v3911_v5 = vpop.permute.xlu0 %3910 }
 0x28a   :  { %v5028_v10 = vadd.f32 %v4918_v0, %v4738_v36  ;;  %v3538_v26 = vpop.f32.mrb[5].mxu1  ;;  %4941 = vmatmul.mubr.msk.f32.vlgmr.msra.gmra.mrb[32].mxu0 %vm504_vm2, %v3637_v4  ;;  %v3639_v9 = vmax.f32 %v3623_v50, 0.0  ;;  %v5189_v4 = vld [vmem:[%s7070_s0 + $0x8] sm:$0xff]  ;;  %v5190_v0 = vld [vmem:[%s7070_s0] sm:$0xff] }
 0x28b   :  { %v3638_v13 = vmax.f32 %v3622_v49, 0.0  ;;  %v5029_v42 = vadd.f32 %v3538_v26, %v1468_v34 }
 0x28c   :  { %v3625_v58 = vadd.f32 %v5028_v10, %v6832_v35 }
 0x28d   :  { %v3624_v24 = vadd.f32 %v5029_v42, %v6832_v35  ;;  %v4921_v44 = vpop.f32.mrb[6].mxu1  ;;  %4943 = vmatprep.mubr.msk.f32.mxu0 %vm504_vm2, %v3638_v13  ;;  %v3915_v33 = vpop.permute.xlu0 %3914 }
 0x28e   :  { %v5030_v17 = vadd.f32 %v4921_v44, %v4741_v45  ;;  %v3548_v48 = vpop.f32.mrb[7].mxu1  ;;  %4944 = vmatmul.mubr.msk.f32.gmra.mrb[34].mxu0 %vm504_vm2, %v3639_v9  ;;  %v3641_v46 = vmax.f32 %v3625_v58, 0.0 }
 0x28f   :  { %v3640_v61 = vmax.f32 %v3624_v24, 0.0  ;;  %v5031_v16 = vadd.f32 %v3548_v48, %v1478_v37 }
 0x290   :  { %v3627_v14 = vadd.f32 %v5030_v17, %v6832_v35 }
 0x291   :  { %v3626_v8 = vadd.f32 %v5031_v16, %v6832_v35  ;;  %v4924_v23 = vpop.f32.mrb[8].mxu1  ;;  %4946 = vmatprep.mubr.msk.f32.mxu0 %vm504_vm2, %v3640_v61  ;;  %v3919_v17 = vpop.permute.xlu0 %3918 }
 0x292   :  { %v5032_v38 = vadd.f32 %v4924_v23, %v4744_v43  ;;  %v3558_v39 = vpop.f32.mrb[9].mxu1  ;;  %4947 = vmatmul.mubr.msk.f32.gmra.mrb[36].mxu0 %vm504_vm2, %v3641_v46  ;;  %v3643_v62 = vmax.f32 %v3627_v14, 0.0  ;;  %v5191_v46 = vld [vmem:[%s7070_s0 + $0x18] sm:$0xff]  ;;  %v5192_v23 = vld [vmem:[%s7070_s0 + $0x10] sm:$0xff] }
 0x293   :  { %v3642_v54 = vmax.f32 %v3626_v8, 0.0  ;;  %v5033_v22 = vadd.f32 %v3558_v39, %v1488_v57 }
 0x294   :  { %v3629_v41 = vadd.f32 %v5032_v38, %v6832_v35 }
 0x295   :  { %v3628_v20 = vadd.f32 %v5033_v22, %v6832_v35  ;;  %v4927_v52 = vpop.f32.mrb[10].mxu1  ;;  %4949 = vmatprep.mubr.msk.f32.mxu0 %vm504_vm2, %v3642_v54 }
 0x296   :  { %v5034_v30 = vadd.f32 %v4927_v52, %v4747_v2  ;;  %v3568_v21 = vpop.f32.mrb[11].mxu1  ;;  %4950 = vmatmul.mubr.msk.f32.gmra.mrb[38].mxu0 %vm504_vm2, %v3643_v62  ;;  %v3645_v31 = vmax.f32 %v3629_v41, 0.0 }
 0x297   :  { %v3644_v29 = vmax.f32 %v3628_v20, 0.0  ;;  %v5035_v11 = vadd.f32 %v3568_v21, %v1498_v1 }
 0x298   :  { %v3631_v51 = vadd.f32 %v5034_v30, %v6832_v35 }
 0x299   :  { %v3630_v3 = vadd.f32 %v5035_v11, %v6832_v35  ;;  %v4930_v40 = vpop.f32.mrb[12].mxu1  ;;  %4952 = vmatprep.mubr.msk.f32.mxu0 %vm504_vm2, %v3644_v29  ;;  %v5193_v11 = vld [vmem:[%s7070_s0 + $0x28] sm:$0xff] }
 0x29a   :  { %v5036_v47 = vadd.f32 %v4930_v40, %v4750_v12  ;;  %v3578_v28 = vpop.f32.mrb[13].mxu1  ;;  %4953 = vmatmul.mubr.msk.f32.gmra.mrb[40].mxu0 %vm504_vm2, %v3645_v31  ;;  %v3647_v36 = vmax.f32 %v3631_v51, 0.0  ;;  %v5194_v40 = vld [vmem:[%s7070_s0 + $0x20] sm:$0xff] }
 0x29b   :  { %v3646_v63 = vmax.f32 %v3630_v3, 0.0  ;;  %v5037_v53 = vadd.f32 %v3578_v28, %v6823_v59  ;;  %v3923_v3 = vpop.permute.xlu0 %3922 }
 0x29c   :  { %v3633_v34 = vadd.f32 %v5036_v47, %v6832_v35 }
 0x29d   :  { %v3632_v45 = vadd.f32 %v5037_v53, %v6832_v35  ;;  %v4933_v37 = vpop.f32.mrb[14].mxu1  ;;  %4955 = vmatprep.mubr.msk.f32.mxu0 %vm504_vm2, %v3646_v63 }
 0x29e   :  { %v5038_v43 = vadd.f32 %v4933_v37, %v6825_v7  ;;  %v3588_v57 = vpop.f32.mrb[15].mxu1  ;;  %4956 = vmatmul.mubr.msk.f32.gmra.mrb[42].mxu0 %vm504_vm2, %v3647_v36  ;;  %v3649_v12 = vmax.f32 %v3633_v34, 0.0  ;;  %v3909_v7 = vpop.permute.xlu1 %3908 }
 0x29f   :  { %v3648_v2 = vmax.f32 %v3632_v45, 0.0  ;;  %v5039_v1 = vadd.f32 %v3588_v57, %v6827_v19  ;;  %v6872_v19 = vld [vmem:[%s7075_s8] ss:$0 sm:$0xff] }
 0x2a0   :  { %v3635_v18 = vadd.f32 %v5038_v43, %v6832_v35 }
 0x2a1   :  { %v3634_v59 = vadd.f32 %v5039_v1, %v6832_v35  ;;  %4958 = vmatprep.mubr.msk.f32.mxu0 %vm504_vm2, %v3648_v2  ;;  %v5195_v2 = vld [vmem:[%s7070_s0 + $0x38] sm:$0xff] }
 0x2a2   :  { %4959 = vmatmul.mubr.msk.f32.gmra.mrb[44].mxu0 %vm504_vm2, %v3649_v12  ;;  %v3651_v32 = vmax.f32 %v3635_v18, 0.0  ;;  %v3913_v6 = vpop.permute.xlu1 %3912  ;;  %v5196_v18 = vld [vmem:[%s7070_s0 + $0x30] sm:$0xff] }
 0x2a3   :  { %v3650_v55 = vmax.f32 %v3634_v59, 0.0 }
 0x2a5   :  { %4961 = vmatprep.mubr.msk.f32.mxu0 %vm504_vm2, %v3650_v55 }
 0x2a6   :  { %4962 = vmatmul.mubr.msk.f32.gmra.mrb[46].mxu0 %vm504_vm2, %v3651_v32  ;;  %v3917_v35 = vpop.permute.xlu1 %3916 }
 0x2aa   :  { %v3921_v42 = vpop.permute.xlu1 %3920 }
 0x2ae   :  { %v3925_v29 = vpop.permute.xlu1 %3924 }
 0x35d   :  { %v4942_v60 = vpop.f32.mrb[32].mxu0 }
 0x35e   :  { %v3785_v25 = vadd.f32 %v4942_v60, %v6872_v19  ;;  %v3779_v15 = vpop.f32.mrb[33].mxu0 }
 0x35f   :  { %v3780_v56 = vadd.f32 %v6872_v19, %v3779_v15 }
 0x360   :  { %v3859_v50 = vadd.f32 %v5189_v4, %v3785_v25  ;;  %v3955_v49 = vadd.f32 %v3909_v7, %v3785_v25  ;;  %v3929_v7 = vpop.permute.xlu1 %3928 }
 0x361   :  { %v3858_v10 = vadd.f32 %v5190_v0, %v3780_v56  ;;  %v3954_v26 = vadd.f32 %v3907_v27, %v3780_v56  ;;  %v4945_v13 = vpop.f32.mrb[34].mxu0  ;;  %v5197_v56 = vld [vmem:[%s7070_s0 + $0x48] sm:$0xff] }
 0x362   :  { %v3875_v9 = vmax.f32 %v3859_v50, 0.0  ;;  %v3971_v58 = vmax.f32 %v3955_v49, 0.0  ;;  %v3795_v24 = vadd.f32 %v4945_v13, %v6872_v19  ;;  %v3789_v44 = vpop.f32.mrb[35].mxu0  ;;  %v5198_v49 = vld [vmem:[%s7070_s0 + $0x40] sm:$0xff] }
 0x363   :  { %v3874_v48 = vmax.f32 %v3858_v10, 0.0  ;;  %v3970_v61 = vmax.f32 %v3954_v26, 0.0  ;;  %v3790_v16 = vadd.f32 %v6872_v19, %v3789_v44 }
 0x364   :  { %3891 = vst.msk [vmem:[%s7076_s10 + $0x8] sm:$0xff] %vm271_vm1, %v3875_v9  ;;  %v3861_v14 = vadd.f32 %v5191_v46, %v3795_v24  ;;  %v3957_v8 = vadd.f32 %v3913_v6, %v3795_v24 }
 0x365   :  { %3890 = vst.msk [vmem:[%s7076_s10] sm:$0xff] %vm271_vm1, %v3874_v48  ;;  %v3860_v38 = vadd.f32 %v5192_v23, %v3790_v16  ;;  %v3956_v39 = vadd.f32 %v3911_v5, %v3790_v16  ;;  %v4948_v54 = vpop.f32.mrb[36].mxu0  ;;  %v3933_v48 = vpop.permute.xlu1 %3932 }
 0x366   :  { %3988 = vst.msk [vmem:[%s7076_s10 + $0x8] sm:$0xff] %vm3986_vm5, %v3971_v58  ;;  %3987 = vst.msk [vmem:[%s7076_s10] sm:$0xff] %vm3986_vm5, %v3970_v61  ;;  %v3877_v22 = vmax.f32 %v3861_v14, 0.0  ;;  %v3973_v62 = vmax.f32 %v3957_v8, 0.0  ;;  %v3805_v41 = vadd.f32 %v4948_v54, %v6872_v19  ;;  %v3799_v20 = vpop.f32.mrb[37].mxu0  ;;  %v5199_v61 = vld [vmem:[%s7070_s0 + $0x58] sm:$0xff] }
 0x367   :  { %v3876_v52 = vmax.f32 %v3860_v38, 0.0  ;;  %v3972_v30 = vmax.f32 %v3956_v39, 0.0  ;;  %v3800_v21 = vadd.f32 %v6872_v19, %v3799_v20  ;;  %v5200_v8 = vld [vmem:[%s7070_s0 + $0x50] sm:$0xff] }
 0x368   :  { %3893 = vst.msk [vmem:[%s7076_s10 + $0x18] sm:$0xff] %vm271_vm1, %v3877_v22  ;;  %v3863_v31 = vadd.f32 %v5193_v11, %v3805_v41  ;;  %v3959_v51 = vadd.f32 %v3917_v35, %v3805_v41 }
 0x369   :  { %3892 = vst.msk [vmem:[%s7076_s10 + $0x10] sm:$0xff] %vm271_vm1, %v3876_v52  ;;  %v3862_v47 = vadd.f32 %v5194_v40, %v3800_v21  ;;  %v3958_v28 = vadd.f32 %v3915_v33, %v3800_v21  ;;  %v4951_v63 = vpop.f32.mrb[38].mxu0  ;;  %v3927_v33 = vpop.permute.xlu0 %3926  ;;  %v5201_v21 = vld [vmem:[%s7070_s0 + $0x68] sm:$0xff] }
 0x36a   :  { %3990 = vst.msk [vmem:[%s7076_s10 + $0x18] sm:$0xff] %vm3986_vm5, %v3973_v62  ;;  %3989 = vst.msk [vmem:[%s7076_s10 + $0x10] sm:$0xff] %vm3986_vm5, %v3972_v30  ;;  %v3879_v53 = vmax.f32 %v3863_v31, 0.0  ;;  %v3975_v36 = vmax.f32 %v3959_v51, 0.0  ;;  %v3815_v34 = vadd.f32 %v4951_v63, %v6872_v19  ;;  %v3809_v45 = vpop.f32.mrb[39].mxu0  ;;  %v5202_v31 = vld [vmem:[%s7070_s0 + $0x60] sm:$0xff] }
 0x36b   :  { %v3878_v37 = vmax.f32 %v3862_v47, 0.0  ;;  %v3974_v43 = vmax.f32 %v3958_v28, 0.0  ;;  %v3810_v57 = vadd.f32 %v6872_v19, %v3809_v45  ;;  %v3937_v47 = vpop.permute.xlu1 %3936 }
 0x36c   :  { %3895 = vst.msk [vmem:[%s7076_s10 + $0x28] sm:$0xff] %vm271_vm1, %v3879_v53  ;;  %v3865_v1 = vadd.f32 %v5195_v2, %v3815_v34  ;;  %v3961_v12 = vadd.f32 %v3921_v42, %v3815_v34 }
 0x36d   :  { %3894 = vst.msk [vmem:[%s7076_s10 + $0x20] sm:$0xff] %vm271_vm1, %v3878_v37  ;;  %v3864_v59 = vadd.f32 %v5196_v18, %v3810_v57  ;;  %v3960_v55 = vadd.f32 %v3919_v17, %v3810_v57  ;;  %v4954_v32 = vpop.f32.mrb[40].mxu0  ;;  %v3931_v14 = vpop.permute.xlu0 %3930  ;;  %v5203_v57 = vld [vmem:[%s7070_s0 + $0x78] sm:$0xff] }
 0x36e   :  { %3992 = vst.msk [vmem:[%s7076_s10 + $0x28] sm:$0xff] %vm3986_vm5, %v3975_v36  ;;  %3991 = vst.msk [vmem:[%s7076_s10 + $0x20] sm:$0xff] %vm3986_vm5, %v3974_v43  ;;  %v3881_v27 = vmax.f32 %v3865_v1, 0.0  ;;  %v3977_v6 = vmax.f32 %v3961_v12, 0.0  ;;  %v3825_v5 = vadd.f32 %v4954_v32, %v6872_v19  ;;  %v3819_v35 = vpop.f32.mrb[41].mxu0 }
 0x36f   :  { %v3880_v60 = vmax.f32 %v3864_v59, 0.0  ;;  %v3976_v25 = vmax.f32 %v3960_v55, 0.0  ;;  %v3820_v15 = vadd.f32 %v6872_v19, %v3819_v35 }
 0x370   :  { %3897 = vst.msk [vmem:[%s7076_s10 + $0x38] sm:$0xff] %vm271_vm1, %v3881_v27  ;;  %v3867_v4 = vadd.f32 %v5197_v56, %v3825_v5  ;;  %v3963_v50 = vadd.f32 %v3925_v29, %v3825_v5 }
 0x371   :  { %3896 = vst.msk [vmem:[%s7076_s10 + $0x30] sm:$0xff] %vm271_vm1, %v3880_v60  ;;  %v3866_v0 = vadd.f32 %v5198_v49, %v3820_v15  ;;  %v3962_v10 = vadd.f32 %v3923_v3, %v3820_v15  ;;  %v4957_v26 = vpop.f32.mrb[42].mxu0  ;;  %v3935_v34 = vpop.permute.xlu0 %3934 }
 0x372   :  { %3994 = vst.msk [vmem:[%s7076_s10 + $0x38] sm:$0xff] %vm3986_vm5, %v3977_v6  ;;  %3993 = vst.msk [vmem:[%s7076_s10 + $0x30] sm:$0xff] %vm3986_vm5, %v3976_v25  ;;  %v3883_v13 = vmax.f32 %v3867_v4, 0.0  ;;  %v3979_v42 = vmax.f32 %v3963_v50, 0.0  ;;  %v3835_v9 = vadd.f32 %v4957_v26, %v6872_v19  ;;  %v3829_v58 = vpop.f32.mrb[43].mxu0 }
 0x373   :  { %v3882_v24 = vmax.f32 %v3866_v0, 0.0  ;;  %v3978_v44 = vmax.f32 %v3962_v10, 0.0  ;;  %v3830_v17 = vadd.f32 %v6872_v19, %v3829_v58 }
 0x374   :  { %3899 = vst.msk [vmem:[%s7076_s10 + $0x48] sm:$0xff] %vm271_vm1, %v3883_v13  ;;  %v3869_v16 = vadd.f32 %v5199_v61, %v3835_v9  ;;  %v3965_v46 = vadd.f32 %v3929_v7, %v3835_v9 }
 0x375   :  { %3898 = vst.msk [vmem:[%s7076_s10 + $0x40] sm:$0xff] %vm271_vm1, %v3882_v24  ;;  %v3868_v23 = vadd.f32 %v5200_v8, %v3830_v17  ;;  %v3964_v38 = vadd.f32 %v3927_v33, %v3830_v17  ;;  %v4960_v39 = vpop.f32.mrb[44].mxu0 }
 0x376   :  { %3996 = vst.msk [vmem:[%s7076_s10 + $0x48] sm:$0xff] %vm3986_vm5, %v3979_v42  ;;  %3995 = vst.msk [vmem:[%s7076_s10 + $0x40] sm:$0xff] %vm3986_vm5, %v3978_v44  ;;  %v3885_v54 = vmax.f32 %v3869_v16, 0.0  ;;  %v3981_v22 = vmax.f32 %v3965_v46, 0.0  ;;  %v3845_v62 = vadd.f32 %v4960_v39, %v6872_v19  ;;  %v3839_v41 = vpop.f32.mrb[45].mxu0 }
 0x377   :  { %v3884_v20 = vmax.f32 %v3868_v23, 0.0  ;;  %v3980_v52 = vmax.f32 %v3964_v38, 0.0  ;;  %v3840_v30 = vadd.f32 %v6872_v19, %v3839_v41 }
 0x378   :  { %3901 = vst.msk [vmem:[%s7076_s10 + $0x58] sm:$0xff] %vm271_vm1, %v3885_v54  ;;  %v3871_v29 = vadd.f32 %v5201_v21, %v3845_v62  ;;  %v3967_v11 = vadd.f32 %v3933_v48, %v3845_v62 }
 0x379   :  { %3900 = vst.msk [vmem:[%s7076_s10 + $0x50] sm:$0xff] %vm271_vm1, %v3884_v20  ;;  %v3870_v51 = vadd.f32 %v5202_v31, %v3840_v30  ;;  %v3966_v3 = vadd.f32 %v3931_v14, %v3840_v30  ;;  %v4963_v40 = vpop.f32.mrb[46].mxu0 }
 0x37a   :  { %3998 = vst.msk [vmem:[%s7076_s10 + $0x58] sm:$0xff] %vm3986_vm5, %v3981_v22  ;;  %3997 = vst.msk [vmem:[%s7076_s10 + $0x50] sm:$0xff] %vm3986_vm5, %v3980_v52  ;;  %v3887_v28 = vmax.f32 %v3871_v29, 0.0  ;;  %v3983_v63 = vmax.f32 %v3967_v11, 0.0  ;;  %v3855_v53 = vadd.f32 %v4963_v40, %v6872_v19  ;;  %v3849_v36 = vpop.f32.mrb[47].mxu0 }
 0x37b   :  { %v3886_v45 = vmax.f32 %v3870_v51, 0.0  ;;  %v3982_v37 = vmax.f32 %v3966_v3, 0.0  ;;  %v3850_v43 = vadd.f32 %v6872_v19, %v3849_v36  ;;  %v5204_v19 = vld [vmem:[%s7070_s0 + $0x70] sm:$0xff] }
 0x37c   :  { %3903 = vst.msk [vmem:[%s7076_s10 + $0x68] sm:$0xff] %vm271_vm1, %v3887_v28  ;;  %v3873_v2 = vadd.f32 %v5203_v57, %v3855_v53  ;;  %v3969_v1 = vadd.f32 %v3937_v47, %v3855_v53 }
 0x37d   :  { %3902 = vst.msk [vmem:[%s7076_s10 + $0x60] sm:$0xff] %vm271_vm1, %v3886_v45  ;;  %v3872_v12 = vadd.f32 %v5204_v19, %v3850_v43  ;;  %v3968_v18 = vadd.f32 %v3935_v34, %v3850_v43 }
 0x37e   :  { %4000 = vst.msk [vmem:[%s7076_s10 + $0x68] sm:$0xff] %vm3986_vm5, %v3983_v63  ;;  %3999 = vst.msk [vmem:[%s7076_s10 + $0x60] sm:$0xff] %vm3986_vm5, %v3982_v37  ;;  %v3889_v59 = vmax.f32 %v3873_v2, 0.0  ;;  %v3985_v55 = vmax.f32 %v3969_v1, 0.0 }
 0x37f   :  { %v3888_v32 = vmax.f32 %v3872_v12, 0.0  ;;  %v3984_v7 = vmax.f32 %v3968_v18, 0.0 }
 0x380   :  { %3905 = vst.msk [vmem:[%s7076_s10 + $0x78] sm:$0xff] %vm271_vm1, %v3889_v59 }
 0x381   :  { %3904 = vst.msk [vmem:[%s7076_s10 + $0x70] sm:$0xff] %vm271_vm1, %v3888_v32 }
 0x382   :  { %4002 = vst.msk [vmem:[%s7076_s10 + $0x78] sm:$0xff] %vm3986_vm5, %v3985_v55  ;;  %4001 = vst.msk [vmem:[%s7076_s10 + $0x70] sm:$0xff] %vm3986_vm5, %v3984_v7 }

</bundles_post_ra>
